<compile_context>
chip_gen: v6e
topology: v6e:2x2x1
jax: 0.10.0
libtpu: 0.0.40
codegen_flags: <defaults>
</compile_context>

<pallas_src>
import functools

import jax
import jax.numpy as jnp
from jax.experimental import pallas as pl
from jax.experimental.pallas import tpu as pltpu

_LANE = 128


def _pad_up(n, m):
    return ((n + m - 1) // m) * m


def _pad2d(a, rows, cols):
    r, c = a.shape
    return jnp.pad(a, ((0, rows - r), (0, cols - c)))


def _tpu_kind():
    try:
        return jax.devices()[0].device_kind.lower()
    except Exception:
        return ""


def _vmem_budget_bytes(kind):
    # v7x: 64 MiB physical per TC -> leave headroom for Mosaic scratch.
    # v5e / v6e: 128 MiB physical.
    if "v7" in kind:
        return 52 << 20
    return 100 << 20


def _max_batch_tile(kind):
    return 256 if "v7" in kind else 512


# --------------------------------------------------------------------------
# Kernel body
# --------------------------------------------------------------------------
def _cff_kernel(n_layers, lat_p, *refs):
    it = iter(refs)
    x_ref, cond_ref, eps_ref = next(it), next(it), next(it)
    wx0, wc0, be0 = next(it), next(it), next(it)
    enc = [(next(it), next(it)) for _ in range(n_layers - 1)]
    w_head, b_head = next(it), next(it)
    wz0, wzc0, bd0 = next(it), next(it), next(it)
    dec = [(next(it), next(it)) for _ in range(n_layers - 1)]
    wo, bo = next(it), next(it)
    out_ref, mean_ref, std_ref = next(it), next(it), next(it)

    bf16 = jnp.bfloat16
    dot = lambda a, b: jnp.dot(a, b, preferred_element_type=jnp.float32)

    xb = x_ref[...].astype(bf16)
    cb = cond_ref[...].astype(bf16)

    # encoder layer 0: relu(cat([x, cond]) @ W + b) == relu(x@Wx + cond@Wc + b)
    h = jnp.maximum(dot(xb, wx0[...]) + dot(cb, wc0[...]) + be0[...], 0.0)
    for w_r, b_r in enc:
        h = jnp.maximum(dot(h.astype(bf16), w_r[...]) + b_r[...], 0.0)

    # fused mu/std head: one (hid, 2*lat) matmul, static lane-aligned split
    hb = h.astype(bf16)
    head = dot(hb, w_head[...]) + b_head[...]
    mean = head[:, :lat_p]
    std = head[:, lat_p:]

    # store mean/std now -> writeback DMA overlaps the decoder matmuls and their
    # live range does not span the decoder.
    mean_ref[...] = mean
    std_ref[...] = std

    # reparameterization (f32): z = mean + eps * exp(0.5 * log_var)
    z = mean + eps_ref[...] * jnp.exp(0.5 * std)

    # decoder layer 0: relu(cat([z, cond]) @ W + b) == relu(z@Wz + cond@Wc + b)
    h = jnp.maximum(dot(z.astype(bf16), wz0[...]) + dot(cb, wzc0[...]) + bd0[...], 0.0)
    for w_r, b_r in dec:
        h = jnp.maximum(dot(h.astype(bf16), w_r[...]) + b_r[...], 0.0)

    # sigmoid: exp + approx reciprocal stay on the EUP slot (no VPU divide)
    logit = dot(h.astype(bf16), wo[...]) + bo[...]
    out_ref[...] = pl.reciprocal(1.0 + jnp.exp(-logit), approx=True)


# --------------------------------------------------------------------------
# Parameters
# --------------------------------------------------------------------------
def init_params(key, n_class, cond_size, in_size, hidden_size, latent_size,
                n_layers):
    """Deterministic synthetic parameters (logical shapes, f32)."""
    keys = iter(jax.random.split(key, 4 * n_layers + 16))

    def w(shape):
        return (jax.random.normal(next(keys), shape, jnp.float32)
                * (1.0 / jnp.sqrt(jnp.float32(shape[0]))))

    p = {"emb": jax.random.normal(next(keys), (n_class, cond_size), jnp.float32)}

    enc, d_in = [], in_size + cond_size
    for _ in range(n_layers):
        enc.append((w((d_in, hidden_size)), jnp.zeros((hidden_size,), jnp.float32)))
        d_in = hidden_size
    p["enc"] = enc

    p["w_mu"], p["b_mu"] = w((hidden_size, latent_size)), jnp.zeros((latent_size,), jnp.float32)
    p["w_std"], p["b_std"] = w((hidden_size, latent_size)), jnp.zeros((latent_size,), jnp.float32)

    dec, d_in = [], latent_size + cond_size
    for _ in range(n_layers):
        dec.append((w((d_in, hidden_size)), jnp.zeros((hidden_size,), jnp.float32)))
        d_in = hidden_size
    p["dec"] = dec

    p["w_out"], p["b_out"] = w((hidden_size, in_size)), jnp.zeros((in_size,), jnp.float32)
    return p


def prepare_params(p, *, in_size, cond_size, hidden_size, latent_size, n_layers):
    """Pad feature dims to multiples of 128, split concat-layer weights, fuse the
    mu/std head, cast weights to bf16 (biases stay f32).  Done once."""
    in_p = _pad_up(in_size, _LANE)
    cond_p = _pad_up(cond_size, _LANE)
    hid_p = _pad_up(hidden_size, _LANE)
    lat_p = _pad_up(latent_size, _LANE)

    def wpad(w_, rows, cols):
        return _pad2d(w_, rows, cols).astype(jnp.bfloat16)

    def bpad(b_, cols):
        return _pad2d(b_.reshape(1, -1), 1, cols).astype(jnp.float32)

    q = {"dims": dict(in_p=in_p, cond_p=cond_p, hid_p=hid_p, lat_p=lat_p)}
    q["emb"] = _pad2d(p["emb"], p["emb"].shape[0], cond_p)          # f32 table

    w0, b0 = p["enc"][0]
    q["enc0_wx"] = wpad(w0[:in_size], in_p, hid_p)
    q["enc0_wc"] = wpad(w0[in_size:], cond_p, hid_p)
    q["enc0_b"] = bpad(b0, hid_p)
    q["enc"] = [(wpad(w_, hid_p, hid_p), bpad(b_, hid_p)) for w_, b_ in p["enc"][1:]]

    # fused mu/std head -> (hid_p, 2*lat_p) so one matmul fills the 256-wide MXU
    q["w_head"] = jnp.concatenate(
        [wpad(p["w_mu"], hid_p, lat_p), wpad(p["w_std"], hid_p, lat_p)], axis=1)
    q["b_head"] = jnp.concatenate(
        [bpad(p["b_mu"], lat_p), bpad(p["b_std"], lat_p)], axis=1)

    wd0, bd0 = p["dec"][0]
    q["dec0_wz"] = wpad(wd0[:latent_size], lat_p, hid_p)
    q["dec0_wc"] = wpad(wd0[latent_size:], cond_p, hid_p)
    q["dec0_b"] = bpad(bd0, hid_p)
    q["dec"] = [(wpad(w_, hid_p, hid_p), bpad(b_, hid_p)) for w_, b_ in p["dec"][1:]]

    q["w_out"], q["b_out"] = wpad(p["w_out"], hid_p, in_p), bpad(p["b_out"], in_p)
    return q


# --------------------------------------------------------------------------
# Forward
# --------------------------------------------------------------------------
def cff_forward(q, x, y, eps, *, n_layers):
    """CFFModel.forward.  x: (B, C, H, W) f32, y: (B,) int32, eps: (B, latent)."""
    d = q["dims"]
    in_p, cond_p, hid_p, lat_p = d["in_p"], d["cond_p"], d["hid_p"], d["lat_p"]

    B = x.shape[0]
    x_flat = x.reshape(B, -1)                       # x.view(B, -1)
    in_size = x_flat.shape[1]
    latent_size = eps.shape[1]

    # nn.Embedding lookup as plain-JAX glue (table already lane-padded).
    cond = jnp.take(q["emb"], y, axis=0)            # (B, cond_p) f32

    # ---- resident weight operands (DMA'd once, single-buffered in VMEM) ----
    weights = [q["enc0_wx"], q["enc0_wc"], q["enc0_b"]]
    for w_, b_ in q["enc"]:
        weights += [w_, b_]
    weights += [q["w_head"], q["b_head"], q["dec0_wz"], q["dec0_wc"], q["dec0_b"]]
    for w_, b_ in q["dec"]:
        weights += [w_, b_]
    weights += [q["w_out"], q["b_out"]]
    weight_bytes = sum(int(a.size) * a.dtype.itemsize for a in weights)

    # ---- batch tiling: >=2 tiles for megacore, minimal padding, VMEM-fit ----
    kind = _tpu_kind()
    budget = _vmem_budget_bytes(kind)
    max_tb = _max_batch_tile(kind)

    def est_vmem(tb, x_item, cond_item, w_factor):
        stream_in = tb * (in_p * x_item + cond_p * cond_item + lat_p * 4)
        stream_out = tb * (in_p * 4 + 2 * lat_p * 4)
        live = tb * (hid_p * 6 + lat_p * 24 + cond_p * 2)   # h(f32)+hb(bf16)+head/z+cond
        return w_factor * weight_bytes + 2 * (stream_in + stream_out) + 2 * live + (8 << 20)

    if B <= 8:
        TB, B_pad, n_tiles = B, B, 1
    else:
        n_tiles = max(2, pl.cdiv(B, max_tb))        # >=2 tiles so both v7x TCs work
        while True:
            TB = _pad_up(pl.cdiv(B, n_tiles), 8)
            if est_vmem(TB, 4, 4, 1) <= budget or TB <= 8:
                break
            n_tiles += 1
        B_pad = n_tiles * TB

    def maybe_pad(a, feat, cast_bf16):
        """Skip the wrapper pad/cast round trip when already tile-aligned
        (the kernel casts to bf16 itself); otherwise fuse pad+cast in one op."""
        pad_rows, pad_cols = B_pad - a.shape[0], feat - a.shape[1]
        if pad_rows == 0 and pad_cols == 0:
            return a
        a = jnp.pad(a, ((0, pad_rows), (0, pad_cols)))
        return a.astype(jnp.bfloat16) if cast_bf16 else a

    x_in = maybe_pad(x_flat, in_p, True)
    cond_in = maybe_pad(cond, cond_p, True)
    eps_in = maybe_pad(eps.astype(jnp.float32), lat_p, False)   # eps stays f32

    operands = [x_in, cond_in, eps_in] + weights

    def stream_spec(feat):
        return pl.BlockSpec((TB, feat), lambda i: (i, 0))

    out_specs = (stream_spec(in_p), stream_spec(lat_p), stream_spec(lat_p))
    out_shapes = (
        jax.ShapeDtypeStruct((B_pad, in_p), jnp.float32),       # out (sigmoid)
        jax.ShapeDtypeStruct((B_pad, lat_p), jnp.float32),      # mean
        jax.ShapeDtypeStruct((B_pad, lat_p), jnp.float32),      # std (log-variance)
    )

    # ---- cost estimate (padded shapes) ----
    mm_kn = (in_p * hid_p + cond_p * hid_p                      # encoder layer 0
             + (n_layers - 1) * hid_p * hid_p                   # encoder rest
             + hid_p * (2 * lat_p)                              # fused mu/std head
             + lat_p * hid_p + cond_p * hid_p                   # decoder layer 0
             + (n_layers - 1) * hid_p * hid_p                   # decoder rest
             + hid_p * in_p)                                    # output proj
    stream_bytes = sum(int(a.size) * a.dtype.itemsize for a in (x_in, cond_in, eps_in))
    out_bytes = sum(int(s.size) * 4 for s in out_shapes)
    cost = pl.CostEstimate(
        flops=2 * B_pad * mm_kn,
        transcendentals=B_pad * (lat_p + 2 * in_p),
        bytes_accessed=int(weight_bytes + stream_bytes + out_bytes))

    kernel = functools.partial(_cff_kernel, n_layers, lat_p)

    def build(single_buffer_weights):
        def resident(arr):
            idx = lambda i: (0, 0)
            if single_buffer_weights:
                return pl.BlockSpec(arr.shape, idx, pipeline_mode=pl.Buffered(1))
            return pl.BlockSpec(arr.shape, idx)

        in_specs = ([stream_spec(in_p), stream_spec(cond_p), stream_spec(lat_p)]
                    + [resident(a) for a in weights])

        w_factor = 1 if single_buffer_weights else 2
        vmem_limit = est_vmem(TB, x_in.dtype.itemsize, cond_in.dtype.itemsize, w_factor)
        vmem_limit = int(min(max(vmem_limit, 32 << 20), budget))

        return pl.pallas_call(
            kernel,
            grid=(n_tiles,),
            out_shape=out_shapes,
            in_specs=in_specs,
            out_specs=out_specs,
            compiler_params=pltpu.CompilerParams(
                dimension_semantics=("parallel",),   # megacore split over batch tiles
                vmem_limit_bytes=vmem_limit),
            cost_estimate=cost,
        )

    try:
        out, mean, std = build(True)(*operands)
    except Exception:
        # TODO(synk): fallback for toolchains that reject pipeline_mode=Buffered(1)
        # on block-invariant specs; weights then get the default double buffer.
        out, mean, std = build(False)(*operands)

    return (out[:B, :in_size], mean[:B, :latent_size], std[:B, :latent_size])


# Pure-JAX reference (same padded bf16 params, same math) for a sanity check.
def cff_reference(q, x, y, eps, *, n_layers):
    d = q["dims"]
    lat_p = d["lat_p"]
    B = x.shape[0]
    x_flat = x.reshape(B, -1)
    in_size = x_flat.shape[1]
    latent_size = eps.shape[1]
    bf16 = jnp.bfloat16
    dot = lambda a, b: jnp.dot(a, b, preferred_element_type=jnp.float32)

    cond = jnp.take(q["emb"], y, axis=0)
    xb = jnp.pad(x_flat, ((0, 0), (0, d["in_p"] - in_size))).astype(bf16)
    cb = cond.astype(bf16)
    ep = jnp.pad(eps, ((0, 0), (0, lat_p - latent_size))).astype(jnp.float32)

    h = jnp.maximum(dot(xb, q["enc0_wx"]) + dot(cb, q["enc0_wc"]) + q["enc0_b"], 0.0)
    for w_, b_ in q["enc"]:
        h = jnp.maximum(dot(h.astype(bf16), w_) + b_, 0.0)
    head = dot(h.astype(bf16), q["w_head"]) + q["b_head"]
    mean, std = head[:, :lat_p], head[:, lat_p:]
    z = mean + ep * jnp.exp(0.5 * std)
    h = jnp.maximum(dot(z.astype(bf16), q["dec0_wz"]) + dot(cb, q["dec0_wc"]) + q["dec0_b"], 0.0)
    for w_, b_ in q["dec"]:
        h = jnp.maximum(dot(h.astype(bf16), w_) + b_, 0.0)
    logit = dot(h.astype(bf16), q["w_out"]) + q["b_out"]
    out = 1.0 / (1.0 + jnp.exp(-logit))
    return out[:, :in_size], mean[:, :latent_size], std[:, :latent_size]


def _run_case(name, key, *, B, C, H, W, n_class, cond_size, hidden_size,
              latent_size, n_layers):
    in_size = C * H * W
    k_param, k_x, k_y, k_eps = jax.random.split(key, 4)
    params = init_params(k_param, n_class, cond_size, in_size, hidden_size,
                         latent_size, n_layers)
    q = prepare_params(params, in_size=in_size, cond_size=cond_size,
                       hidden_size=hidden_size, latent_size=latent_size,
                       n_layers=n_layers)

    x = jax.random.uniform(k_x, (B, C, H, W), jnp.float32)
    y = jax.random.randint(k_y, (B,), 0, n_class, jnp.int32)
    eps = jax.random.normal(k_eps, (B, latent_size), jnp.float32)

    out, mean, std = cff_forward(q, x, y, eps, n_layers=n_layers)
    jax.block_until_ready((out, mean, std))

    assert out.shape == (B, in_size), name
    assert mean.shape == (B, latent_size), name
    assert std.shape == (B, latent_size), name
    assert bool(jnp.all(jnp.isfinite(out))), name
    # approx reciprocal may overshoot 1.0 by ~1e-4
    assert bool(jnp.all((out >= 0.0) & (out <= 1.0 + 1e-3))), name

    out_r, mean_r, std_r = cff_reference(q, x, y, eps, n_layers=n_layers)
    assert bool(jnp.allclose(out, out_r, atol=2e-2, rtol=2e-2)), name
    assert bool(jnp.allclose(mean, mean_r, atol=2e-2, rtol=2e-2)), name
    assert bool(jnp.allclose(std, std_r, atol=2e-2, rtol=2e-2)), name


if __name__ == "__main__":
    key = jax.random.PRNGKey(0)
    k_small, k_big = jax.random.split(key)

    # Small, forward-consistent shapes (single tile, full-array blocks).
    _run_case("small", k_small, B=2, C=1, H=4, W=8, n_class=4, cond_size=8,
              hidden_size=32, latent_size=16, n_layers=2)

    # Multi-tile streaming path: >=2 batch tiles (megacore split), (8,128)
    # block constraints, 3-layer encoder/decoder, batch not a tile multiple.
    _run_case("multi_tile", k_big, B=520, C=2, H=10, W=10, n_class=10,
              cond_size=24, hidden_size=512, latent_size=96, n_layers=3)

    print("KERNEL_OK")
</pallas_src>

<mosaic_0001>
module attributes {stable_mosaic.version = 11 : i64} {
  func.func @_cff_kernel(%arg0: i32, %arg1: memref<2x128xbf16, #tpu.memory_space<vmem>>, %arg2: memref<2x128xf32, #tpu.memory_space<vmem>>, %arg3: memref<2x128xf32, #tpu.memory_space<vmem>>, %arg4: memref<128x128xbf16, #tpu.memory_space<vmem>>, %arg5: memref<128x128xbf16, #tpu.memory_space<vmem>>, %arg6: memref<1x128xf32, #tpu.memory_space<vmem>>, %arg7: memref<128x128xbf16, #tpu.memory_space<vmem>>, %arg8: memref<1x128xf32, #tpu.memory_space<vmem>>, %arg9: memref<128x256xbf16, #tpu.memory_space<vmem>>, %arg10: memref<1x256xf32, #tpu.memory_space<vmem>>, %arg11: memref<128x128xbf16, #tpu.memory_space<vmem>>, %arg12: memref<128x128xbf16, #tpu.memory_space<vmem>>, %arg13: memref<1x128xf32, #tpu.memory_space<vmem>>, %arg14: memref<128x128xbf16, #tpu.memory_space<vmem>>, %arg15: memref<1x128xf32, #tpu.memory_space<vmem>>, %arg16: memref<128x128xbf16, #tpu.memory_space<vmem>>, %arg17: memref<1x128xf32, #tpu.memory_space<vmem>>, %arg18: memref<2x128xf32, #tpu.memory_space<vmem>>, %arg19: memref<2x128xf32, #tpu.memory_space<vmem>>, %arg20: memref<2x128xf32, #tpu.memory_space<vmem>>) attributes {dimension_semantics = [#tpu.dimension_semantics<parallel>], iteration_bounds = array<i64: 1>, scalar_prefetch = 0 : i64, scratch_operands = 0 : i64, tpu.core_type = #tpu.core_type<tc>, window_params = [{transform_indices = @transform_0, window_bounds = array<i64: 2, 128>}, {transform_indices = @transform_1, window_bounds = array<i64: 2, 128>}, {transform_indices = @transform_2, window_bounds = array<i64: 2, 128>}, {pipeline_mode = #tpu.pipeline_mode<synchronous>, transform_indices = @transform_3, window_bounds = array<i64: 128, 128>}, {pipeline_mode = #tpu.pipeline_mode<synchronous>, transform_indices = @transform_4, window_bounds = array<i64: 128, 128>}, {pipeline_mode = #tpu.pipeline_mode<synchronous>, transform_indices = @transform_5, window_bounds = array<i64: 1, 128>}, {pipeline_mode = #tpu.pipeline_mode<synchronous>, transform_indices = @transform_6, window_bounds = array<i64: 128, 128>}, {pipeline_mode = #tpu.pipeline_mode<synchronous>, transform_indices = @transform_7, window_bounds = array<i64: 1, 128>}, {pipeline_mode = #tpu.pipeline_mode<synchronous>, transform_indices = @transform_8, window_bounds = array<i64: 128, 256>}, {pipeline_mode = #tpu.pipeline_mode<synchronous>, transform_indices = @transform_9, window_bounds = array<i64: 1, 256>}, {pipeline_mode = #tpu.pipeline_mode<synchronous>, transform_indices = @transform_10, window_bounds = array<i64: 128, 128>}, {pipeline_mode = #tpu.pipeline_mode<synchronous>, transform_indices = @transform_11, window_bounds = array<i64: 128, 128>}, {pipeline_mode = #tpu.pipeline_mode<synchronous>, transform_indices = @transform_12, window_bounds = array<i64: 1, 128>}, {pipeline_mode = #tpu.pipeline_mode<synchronous>, transform_indices = @transform_13, window_bounds = array<i64: 128, 128>}, {pipeline_mode = #tpu.pipeline_mode<synchronous>, transform_indices = @transform_14, window_bounds = array<i64: 1, 128>}, {pipeline_mode = #tpu.pipeline_mode<synchronous>, transform_indices = @transform_15, window_bounds = array<i64: 128, 128>}, {pipeline_mode = #tpu.pipeline_mode<synchronous>, transform_indices = @transform_16, window_bounds = array<i64: 1, 128>}, {transform_indices = @transform_17, window_bounds = array<i64: 2, 128>}, {transform_indices = @transform_18, window_bounds = array<i64: 2, 128>}, {transform_indices = @transform_19, window_bounds = array<i64: 2, 128>}]} {
    %c0 = arith.constant 0 : index
    %c0_0 = arith.constant 0 : index
    %0 = vector.load %arg1[%c0, %c0_0] : memref<2x128xbf16, #tpu.memory_space<vmem>>, vector<2x128xbf16>
    %c0_1 = arith.constant 0 : index
    %c0_2 = arith.constant 0 : index
    %1 = vector.load %arg2[%c0_1, %c0_2] : memref<2x128xf32, #tpu.memory_space<vmem>>, vector<2x128xf32>
    %2 = arith.truncf %1 : vector<2x128xf32> to vector<2x128xbf16>
    %c0_3 = arith.constant 0 : index
    %c0_4 = arith.constant 0 : index
    %3 = vector.load %arg4[%c0_3, %c0_4] : memref<128x128xbf16, #tpu.memory_space<vmem>>, vector<128x128xbf16>
    %cst = arith.constant dense<0.000000e+00> : vector<2x128xf32>
    %4 = tpu.matmul %0, %3, %cst {dimension_numbers = #tpu.dot_dimension_numbers<[1], [0], [0], [1], [0, 0, 1, 1], [], []>} : vector<2x128xbf16>, vector<128x128xbf16>, vector<2x128xf32> -> vector<2x128xf32>
    %c0_5 = arith.constant 0 : index
    %c0_6 = arith.constant 0 : index
    %5 = vector.load %arg5[%c0_5, %c0_6] : memref<128x128xbf16, #tpu.memory_space<vmem>>, vector<128x128xbf16>
    %cst_7 = arith.constant dense<0.000000e+00> : vector<2x128xf32>
    %6 = tpu.matmul %2, %5, %cst_7 {dimension_numbers = #tpu.dot_dimension_numbers<[1], [0], [0], [1], [0, 0, 1, 1], [], []>} : vector<2x128xbf16>, vector<128x128xbf16>, vector<2x128xf32> -> vector<2x128xf32>
    %7 = arith.addf %4, %6 : vector<2x128xf32>
    %c0_8 = arith.constant 0 : index
    %c0_9 = arith.constant 0 : index
    %8 = vector.load %arg6[%c0_8, %c0_9] : memref<1x128xf32, #tpu.memory_space<vmem>>, vector<1x128xf32>
    %9 = vector.broadcast %8 : vector<1x128xf32> to vector<2x128xf32>
    %10 = arith.addf %7, %9 : vector<2x128xf32>
    %cst_10 = arith.constant 0.000000e+00 : f32
    %11 = vector.broadcast %cst_10 : f32 to vector<2x128xf32>
    %12 = arith.maximumf %10, %11 : vector<2x128xf32>
    %13 = arith.truncf %12 : vector<2x128xf32> to vector<2x128xbf16>
    %c0_11 = arith.constant 0 : index
    %c0_12 = arith.constant 0 : index
    %14 = vector.load %arg7[%c0_11, %c0_12] : memref<128x128xbf16, #tpu.memory_space<vmem>>, vector<128x128xbf16>
    %cst_13 = arith.constant dense<0.000000e+00> : vector<2x128xf32>
    %15 = tpu.matmul %13, %14, %cst_13 {dimension_numbers = #tpu.dot_dimension_numbers<[1], [0], [0], [1], [0, 0, 1, 1], [], []>} : vector<2x128xbf16>, vector<128x128xbf16>, vector<2x128xf32> -> vector<2x128xf32>
    %c0_14 = arith.constant 0 : index
    %c0_15 = arith.constant 0 : index
    %16 = vector.load %arg8[%c0_14, %c0_15] : memref<1x128xf32, #tpu.memory_space<vmem>>, vector<1x128xf32>
    %17 = vector.broadcast %16 : vector<1x128xf32> to vector<2x128xf32>
    %18 = arith.addf %15, %17 : vector<2x128xf32>
    %cst_16 = arith.constant 0.000000e+00 : f32
    %19 = vector.broadcast %cst_16 : f32 to vector<2x128xf32>
    %20 = arith.maximumf %18, %19 : vector<2x128xf32>
    %21 = arith.truncf %20 : vector<2x128xf32> to vector<2x128xbf16>
    %c0_17 = arith.constant 0 : index
    %c0_18 = arith.constant 0 : index
    %22 = vector.load %arg9[%c0_17, %c0_18] : memref<128x256xbf16, #tpu.memory_space<vmem>>, vector<128x256xbf16>
    %cst_19 = arith.constant dense<0.000000e+00> : vector<2x256xf32>
    %23 = tpu.matmul %21, %22, %cst_19 {dimension_numbers = #tpu.dot_dimension_numbers<[1], [0], [0], [1], [0, 0, 1, 1], [], []>} : vector<2x128xbf16>, vector<128x256xbf16>, vector<2x256xf32> -> vector<2x256xf32>
    %c0_20 = arith.constant 0 : index
    %c0_21 = arith.constant 0 : index
    %24 = vector.load %arg10[%c0_20, %c0_21] : memref<1x256xf32, #tpu.memory_space<vmem>>, vector<1x256xf32>
    %25 = vector.broadcast %24 : vector<1x256xf32> to vector<2x256xf32>
    %26 = arith.addf %23, %25 : vector<2x256xf32>
    %27 = vector.extract_strided_slice %26 {offsets = [0, 0], sizes = [2, 128], strides = [1, 1]} : vector<2x256xf32> to vector<2x128xf32>
    %28 = vector.extract_strided_slice %26 {offsets = [0, 128], sizes = [2, 128], strides = [1, 1]} : vector<2x256xf32> to vector<2x128xf32>
    %c0_22 = arith.constant 0 : index
    %c0_23 = arith.constant 0 : index
    %29 = vector.load %arg19[%c0_22, %c0_23] : memref<2x128xf32, #tpu.memory_space<vmem>>, vector<2x128xf32>
    tpu.vector_store %arg19[%c0_22, %c0_23], %27 {strides = array<i32>} : memref<2x128xf32, #tpu.memory_space<vmem>>, vector<2x128xf32>,
    %c0_24 = arith.constant 0 : index
    %c0_25 = arith.constant 0 : index
    %30 = vector.load %arg20[%c0_24, %c0_25] : memref<2x128xf32, #tpu.memory_space<vmem>>, vector<2x128xf32>
    tpu.vector_store %arg20[%c0_24, %c0_25], %28 {strides = array<i32>} : memref<2x128xf32, #tpu.memory_space<vmem>>, vector<2x128xf32>,
    %c0_26 = arith.constant 0 : index
    %c0_27 = arith.constant 0 : index
    %31 = vector.load %arg3[%c0_26, %c0_27] : memref<2x128xf32, #tpu.memory_space<vmem>>, vector<2x128xf32>
    %cst_28 = arith.constant 5.000000e-01 : f32
    %32 = vector.broadcast %cst_28 : f32 to vector<2x128xf32>
    %33 = arith.mulf %32, %28 : vector<2x128xf32>
    %34 = math.exp %33 : vector<2x128xf32>
    %35 = arith.mulf %31, %34 : vector<2x128xf32>
    %36 = arith.addf %27, %35 : vector<2x128xf32>
    %37 = arith.truncf %36 : vector<2x128xf32> to vector<2x128xbf16>
    %c0_29 = arith.constant 0 : index
    %c0_30 = arith.constant 0 : index
    %38 = vector.load %arg11[%c0_29, %c0_30] : memref<128x128xbf16, #tpu.memory_space<vmem>>, vector<128x128xbf16>
    %cst_31 = arith.constant dense<0.000000e+00> : vector<2x128xf32>
    %39 = tpu.matmul %37, %38, %cst_31 {dimension_numbers = #tpu.dot_dimension_numbers<[1], [0], [0], [1], [0, 0, 1, 1], [], []>} : vector<2x128xbf16>, vector<128x128xbf16>, vector<2x128xf32> -> vector<2x128xf32>
    %c0_32 = arith.constant 0 : index
    %c0_33 = arith.constant 0 : index
    %40 = vector.load %arg12[%c0_32, %c0_33] : memref<128x128xbf16, #tpu.memory_space<vmem>>, vector<128x128xbf16>
    %cst_34 = arith.constant dense<0.000000e+00> : vector<2x128xf32>
    %41 = tpu.matmul %2, %40, %cst_34 {dimension_numbers = #tpu.dot_dimension_numbers<[1], [0], [0], [1], [0, 0, 1, 1], [], []>} : vector<2x128xbf16>, vector<128x128xbf16>, vector<2x128xf32> -> vector<2x128xf32>
    %42 = arith.addf %39, %41 : vector<2x128xf32>
    %c0_35 = arith.constant 0 : index
    %c0_36 = arith.constant 0 : index
    %43 = vector.load %arg13[%c0_35, %c0_36] : memref<1x128xf32, #tpu.memory_space<vmem>>, vector<1x128xf32>
    %44 = vector.broadcast %43 : vector<1x128xf32> to vector<2x128xf32>
    %45 = arith.addf %42, %44 : vector<2x128xf32>
    %cst_37 = arith.constant 0.000000e+00 : f32
    %46 = vector.broadcast %cst_37 : f32 to vector<2x128xf32>
    %47 = arith.maximumf %45, %46 : vector<2x128xf32>
    %48 = arith.truncf %47 : vector<2x128xf32> to vector<2x128xbf16>
    %c0_38 = arith.constant 0 : index
    %c0_39 = arith.constant 0 : index
    %49 = vector.load %arg14[%c0_38, %c0_39] : memref<128x128xbf16, #tpu.memory_space<vmem>>, vector<128x128xbf16>
    %cst_40 = arith.constant dense<0.000000e+00> : vector<2x128xf32>
    %50 = tpu.matmul %48, %49, %cst_40 {dimension_numbers = #tpu.dot_dimension_numbers<[1], [0], [0], [1], [0, 0, 1, 1], [], []>} : vector<2x128xbf16>, vector<128x128xbf16>, vector<2x128xf32> -> vector<2x128xf32>
    %c0_41 = arith.constant 0 : index
    %c0_42 = arith.constant 0 : index
    %51 = vector.load %arg15[%c0_41, %c0_42] : memref<1x128xf32, #tpu.memory_space<vmem>>, vector<1x128xf32>
    %52 = vector.broadcast %51 : vector<1x128xf32> to vector<2x128xf32>
    %53 = arith.addf %50, %52 : vector<2x128xf32>
    %cst_43 = arith.constant 0.000000e+00 : f32
    %54 = vector.broadcast %cst_43 : f32 to vector<2x128xf32>
    %55 = arith.maximumf %53, %54 : vector<2x128xf32>
    %56 = arith.truncf %55 : vector<2x128xf32> to vector<2x128xbf16>
    %c0_44 = arith.constant 0 : index
    %c0_45 = arith.constant 0 : index
    %57 = vector.load %arg16[%c0_44, %c0_45] : memref<128x128xbf16, #tpu.memory_space<vmem>>, vector<128x128xbf16>
    %cst_46 = arith.constant dense<0.000000e+00> : vector<2x128xf32>
    %58 = tpu.matmul %56, %57, %cst_46 {dimension_numbers = #tpu.dot_dimension_numbers<[1], [0], [0], [1], [0, 0, 1, 1], [], []>} : vector<2x128xbf16>, vector<128x128xbf16>, vector<2x128xf32> -> vector<2x128xf32>
    %c0_47 = arith.constant 0 : index
    %c0_48 = arith.constant 0 : index
    %59 = vector.load %arg17[%c0_47, %c0_48] : memref<1x128xf32, #tpu.memory_space<vmem>>, vector<1x128xf32>
    %60 = vector.broadcast %59 : vector<1x128xf32> to vector<2x128xf32>
    %61 = arith.addf %58, %60 : vector<2x128xf32>
    %cst_49 = arith.constant 0.000000e+00 : f32
    %62 = vector.broadcast %cst_49 : f32 to vector<2x128xf32>
    %63 = arith.subf %62, %61 : vector<2x128xf32>
    %64 = math.exp %63 : vector<2x128xf32>
    %cst_50 = arith.constant 1.000000e+00 : f32
    %65 = vector.broadcast %cst_50 : f32 to vector<2x128xf32>
    %66 = arith.addf %65, %64 : vector<2x128xf32>
    %67 = tpu.reciprocal %66 {approx = true} : vector<2x128xf32> -> vector<2x128xf32>
    %c0_51 = arith.constant 0 : index
    %c0_52 = arith.constant 0 : index
    %68 = vector.load %arg18[%c0_51, %c0_52] : memref<2x128xf32, #tpu.memory_space<vmem>>, vector<2x128xf32>
    tpu.vector_store %arg18[%c0_51, %c0_52], %67 {strides = array<i32>} : memref<2x128xf32, #tpu.memory_space<vmem>>, vector<2x128xf32>,
    return
  }
  func.func @transform_0(%arg0: i32) -> (i32, i32) {
    %c0_i32 = arith.constant 0 : i32
    %c0_i32_0 = arith.constant 0 : i32
    return %arg0, %c0_i32 : i32, i32
  }
  func.func @transform_1(%arg0: i32) -> (i32, i32) {
    %c0_i32 = arith.constant 0 : i32
    %c0_i32_0 = arith.constant 0 : i32
    return %arg0, %c0_i32 : i32, i32
  }
  func.func @transform_2(%arg0: i32) -> (i32, i32) {
    %c0_i32 = arith.constant 0 : i32
    %c0_i32_0 = arith.constant 0 : i32
    return %arg0, %c0_i32 : i32, i32
  }
  func.func @transform_3(%arg0: i32) -> (i32, i32) {
    %c0_i32 = arith.constant 0 : i32
    %c0_i32_0 = arith.constant 0 : i32
    %c0_i32_1 = arith.constant 0 : i32
    return %c0_i32, %c0_i32_0 : i32, i32
  }
  func.func @transform_4(%arg0: i32) -> (i32, i32) {
    %c0_i32 = arith.constant 0 : i32
    %c0_i32_0 = arith.constant 0 : i32
    %c0_i32_1 = arith.constant 0 : i32
    return %c0_i32, %c0_i32_0 : i32, i32
  }
  func.func @transform_5(%arg0: i32) -> (i32, i32) {
    %c0_i32 = arith.constant 0 : i32
    %c0_i32_0 = arith.constant 0 : i32
    %c0_i32_1 = arith.constant 0 : i32
    return %c0_i32, %c0_i32_0 : i32, i32
  }
  func.func @transform_6(%arg0: i32) -> (i32, i32) {
    %c0_i32 = arith.constant 0 : i32
    %c0_i32_0 = arith.constant 0 : i32
    %c0_i32_1 = arith.constant 0 : i32
    return %c0_i32, %c0_i32_0 : i32, i32
  }
  func.func @transform_7(%arg0: i32) -> (i32, i32) {
    %c0_i32 = arith.constant 0 : i32
    %c0_i32_0 = arith.constant 0 : i32
    %c0_i32_1 = arith.constant 0 : i32
    return %c0_i32, %c0_i32_0 : i32, i32
  }
  func.func @transform_8(%arg0: i32) -> (i32, i32) {
    %c0_i32 = arith.constant 0 : i32
    %c0_i32_0 = arith.constant 0 : i32
    %c0_i32_1 = arith.constant 0 : i32
    return %c0_i32, %c0_i32_0 : i32, i32
  }
  func.func @transform_9(%arg0: i32) -> (i32, i32) {
    %c0_i32 = arith.constant 0 : i32
    %c0_i32_0 = arith.constant 0 : i32
    %c0_i32_1 = arith.constant 0 : i32
    return %c0_i32, %c0_i32_0 : i32, i32
  }
  func.func @transform_10(%arg0: i32) -> (i32, i32) {
    %c0_i32 = arith.constant 0 : i32
    %c0_i32_0 = arith.constant 0 : i32
    %c0_i32_1 = arith.constant 0 : i32
    return %c0_i32, %c0_i32_0 : i32, i32
  }
  func.func @transform_11(%arg0: i32) -> (i32, i32) {
    %c0_i32 = arith.constant 0 : i32
    %c0_i32_0 = arith.constant 0 : i32
    %c0_i32_1 = arith.constant 0 : i32
    return %c0_i32, %c0_i32_0 : i32, i32
  }
  func.func @transform_12(%arg0: i32) -> (i32, i32) {
    %c0_i32 = arith.constant 0 : i32
    %c0_i32_0 = arith.constant 0 : i32
    %c0_i32_1 = arith.constant 0 : i32
    return %c0_i32, %c0_i32_0 : i32, i32
  }
  func.func @transform_13(%arg0: i32) -> (i32, i32) {
    %c0_i32 = arith.constant 0 : i32
    %c0_i32_0 = arith.constant 0 : i32
    %c0_i32_1 = arith.constant 0 : i32
    return %c0_i32, %c0_i32_0 : i32, i32
  }
  func.func @transform_14(%arg0: i32) -> (i32, i32) {
    %c0_i32 = arith.constant 0 : i32
    %c0_i32_0 = arith.constant 0 : i32
    %c0_i32_1 = arith.constant 0 : i32
    return %c0_i32, %c0_i32_0 : i32, i32
  }
  func.func @transform_15(%arg0: i32) -> (i32, i32) {
    %c0_i32 = arith.constant 0 : i32
    %c0_i32_0 = arith.constant 0 : i32
    %c0_i32_1 = arith.constant 0 : i32
    return %c0_i32, %c0_i32_0 : i32, i32
  }
  func.func @transform_16(%arg0: i32) -> (i32, i32) {
    %c0_i32 = arith.constant 0 : i32
    %c0_i32_0 = arith.constant 0 : i32
    %c0_i32_1 = arith.constant 0 : i32
    return %c0_i32, %c0_i32_0 : i32, i32
  }
  func.func @transform_17(%arg0: i32) -> (i32, i32) {
    %c0_i32 = arith.constant 0 : i32
    %c0_i32_0 = arith.constant 0 : i32
    return %arg0, %c0_i32 : i32, i32
  }
  func.func @transform_18(%arg0: i32) -> (i32, i32) {
    %c0_i32 = arith.constant 0 : i32
    %c0_i32_0 = arith.constant 0 : i32
    return %arg0, %c0_i32 : i32, i32
  }
  func.func @transform_19(%arg0: i32) -> (i32, i32) {
    %c0_i32 = arith.constant 0 : i32
    %c0_i32_0 = arith.constant 0 : i32
    return %arg0, %c0_i32 : i32, i32
  }
}

module attributes {stable_mosaic.version = 11 : i64} {
  func.func @_cff_kernel(%arg0: i32, %arg1: memref<2x128xbf16, #tpu.memory_space<vmem>>, %arg2: memref<2x128xf32, #tpu.memory_space<vmem>>, %arg3: memref<2x128xf32, #tpu.memory_space<vmem>>, %arg4: memref<128x128xbf16, #tpu.memory_space<vmem>>, %arg5: memref<128x128xbf16, #tpu.memory_space<vmem>>, %arg6: memref<1x128xf32, #tpu.memory_space<vmem>>, %arg7: memref<128x128xbf16, #tpu.memory_space<vmem>>, %arg8: memref<1x128xf32, #tpu.memory_space<vmem>>, %arg9: memref<128x256xbf16, #tpu.memory_space<vmem>>, %arg10: memref<1x256xf32, #tpu.memory_space<vmem>>, %arg11: memref<128x128xbf16, #tpu.memory_space<vmem>>, %arg12: memref<128x128xbf16, #tpu.memory_space<vmem>>, %arg13: memref<1x128xf32, #tpu.memory_space<vmem>>, %arg14: memref<128x128xbf16, #tpu.memory_space<vmem>>, %arg15: memref<1x128xf32, #tpu.memory_space<vmem>>, %arg16: memref<128x128xbf16, #tpu.memory_space<vmem>>, %arg17: memref<1x128xf32, #tpu.memory_space<vmem>>, %arg18: memref<2x128xf32, #tpu.memory_space<vmem>>, %arg19: memref<2x128xf32, #tpu.memory_space<vmem>>, %arg20: memref<2x128xf32, #tpu.memory_space<vmem>>) attributes {dimension_semantics = [#tpu.dimension_semantics<parallel>], iteration_bounds = array<i64: 1>, scalar_prefetch = 0 : i64, scratch_operands = 0 : i64, tpu.core_type = #tpu.core_type<tc>, window_params = [{transform_indices = @transform_0, window_bounds = array<i64: 2, 128>}, {transform_indices = @transform_1, window_bounds = array<i64: 2, 128>}, {transform_indices = @transform_2, window_bounds = array<i64: 2, 128>}, {pipeline_mode = #tpu.pipeline_mode<synchronous>, transform_indices = @transform_3, window_bounds = array<i64: 128, 128>}, {pipeline_mode = #tpu.pipeline_mode<synchronous>, transform_indices = @transform_4, window_bounds = array<i64: 128, 128>}, {pipeline_mode = #tpu.pipeline_mode<synchronous>, transform_indices = @transform_5, window_bounds = array<i64: 1, 128>}, {pipeline_mode = #tpu.pipeline_mode<synchronous>, transform_indices = @transform_6, window_bounds = array<i64: 128, 128>}, {pipeline_mode = #tpu.pipeline_mode<synchronous>, transform_indices = @transform_7, window_bounds = array<i64: 1, 128>}, {pipeline_mode = #tpu.pipeline_mode<synchronous>, transform_indices = @transform_8, window_bounds = array<i64: 128, 256>}, {pipeline_mode = #tpu.pipeline_mode<synchronous>, transform_indices = @transform_9, window_bounds = array<i64: 1, 256>}, {pipeline_mode = #tpu.pipeline_mode<synchronous>, transform_indices = @transform_10, window_bounds = array<i64: 128, 128>}, {pipeline_mode = #tpu.pipeline_mode<synchronous>, transform_indices = @transform_11, window_bounds = array<i64: 128, 128>}, {pipeline_mode = #tpu.pipeline_mode<synchronous>, transform_indices = @transform_12, window_bounds = array<i64: 1, 128>}, {pipeline_mode = #tpu.pipeline_mode<synchronous>, transform_indices = @transform_13, window_bounds = array<i64: 128, 128>}, {pipeline_mode = #tpu.pipeline_mode<synchronous>, transform_indices = @transform_14, window_bounds = array<i64: 1, 128>}, {pipeline_mode = #tpu.pipeline_mode<synchronous>, transform_indices = @transform_15, window_bounds = array<i64: 128, 128>}, {pipeline_mode = #tpu.pipeline_mode<synchronous>, transform_indices = @transform_16, window_bounds = array<i64: 1, 128>}, {transform_indices = @transform_17, window_bounds = array<i64: 2, 128>}, {transform_indices = @transform_18, window_bounds = array<i64: 2, 128>}, {transform_indices = @transform_19, window_bounds = array<i64: 2, 128>}]} {
    %c0 = arith.constant 0 : index
    %c0_0 = arith.constant 0 : index
    %0 = vector.load %arg1[%c0, %c0_0] : memref<2x128xbf16, #tpu.memory_space<vmem>>, vector<2x128xbf16>
    %c0_1 = arith.constant 0 : index
    %c0_2 = arith.constant 0 : index
    %1 = vector.load %arg2[%c0_1, %c0_2] : memref<2x128xf32, #tpu.memory_space<vmem>>, vector<2x128xf32>
    %2 = arith.truncf %1 : vector<2x128xf32> to vector<2x128xbf16>
    %c0_3 = arith.constant 0 : index
    %c0_4 = arith.constant 0 : index
    %3 = vector.load %arg4[%c0_3, %c0_4] : memref<128x128xbf16, #tpu.memory_space<vmem>>, vector<128x128xbf16>
    %cst = arith.constant dense<0.000000e+00> : vector<2x128xf32>
    %4 = tpu.matmul %0, %3, %cst {dimension_numbers = #tpu.dot_dimension_numbers<[1], [0], [0], [1], [0, 0, 1, 1], [], []>} : vector<2x128xbf16>, vector<128x128xbf16>, vector<2x128xf32> -> vector<2x128xf32>
    %c0_5 = arith.constant 0 : index
    %c0_6 = arith.constant 0 : index
    %5 = vector.load %arg5[%c0_5, %c0_6] : memref<128x128xbf16, #tpu.memory_space<vmem>>, vector<128x128xbf16>
    %cst_7 = arith.constant dense<0.000000e+00> : vector<2x128xf32>
    %6 = tpu.matmul %2, %5, %cst_7 {dimension_numbers = #tpu.dot_dimension_numbers<[1], [0], [0], [1], [0, 0, 1, 1], [], []>} : vector<2x128xbf16>, vector<128x128xbf16>, vector<2x128xf32> -> vector<2x128xf32>
    %7 = arith.addf %4, %6 : vector<2x128xf32>
    %c0_8 = arith.constant 0 : index
    %c0_9 = arith.constant 0 : index
    %8 = vector.load %arg6[%c0_8, %c0_9] : memref<1x128xf32, #tpu.memory_space<vmem>>, vector<1x128xf32>
    %9 = vector.broadcast %8 : vector<1x128xf32> to vector<2x128xf32>
    %10 = arith.addf %7, %9 : vector<2x128xf32>
    %cst_10 = arith.constant 0.000000e+00 : f32
    %11 = vector.broadcast %cst_10 : f32 to vector<2x128xf32>
    %12 = arith.maximumf %10, %11 : vector<2x128xf32>
    %13 = arith.truncf %12 : vector<2x128xf32> to vector<2x128xbf16>
    %c0_11 = arith.constant 0 : index
    %c0_12 = arith.constant 0 : index
    %14 = vector.load %arg7[%c0_11, %c0_12] : memref<128x128xbf16, #tpu.memory_space<vmem>>, vector<128x128xbf16>
    %cst_13 = arith.constant dense<0.000000e+00> : vector<2x128xf32>
    %15 = tpu.matmul %13, %14, %cst_13 {dimension_numbers = #tpu.dot_dimension_numbers<[1], [0], [0], [1], [0, 0, 1, 1], [], []>} : vector<2x128xbf16>, vector<128x128xbf16>, vector<2x128xf32> -> vector<2x128xf32>
    %c0_14 = arith.constant 0 : index
    %c0_15 = arith.constant 0 : index
    %16 = vector.load %arg8[%c0_14, %c0_15] : memref<1x128xf32, #tpu.memory_space<vmem>>, vector<1x128xf32>
    %17 = vector.broadcast %16 : vector<1x128xf32> to vector<2x128xf32>
    %18 = arith.addf %15, %17 : vector<2x128xf32>
    %cst_16 = arith.constant 0.000000e+00 : f32
    %19 = vector.broadcast %cst_16 : f32 to vector<2x128xf32>
    %20 = arith.maximumf %18, %19 : vector<2x128xf32>
    %21 = arith.truncf %20 : vector<2x128xf32> to vector<2x128xbf16>
    %c0_17 = arith.constant 0 : index
    %c0_18 = arith.constant 0 : index
    %22 = vector.load %arg9[%c0_17, %c0_18] : memref<128x256xbf16, #tpu.memory_space<vmem>>, vector<128x256xbf16>
    %cst_19 = arith.constant dense<0.000000e+00> : vector<2x256xf32>
    %23 = tpu.matmul %21, %22, %cst_19 {dimension_numbers = #tpu.dot_dimension_numbers<[1], [0], [0], [1], [0, 0, 1, 1], [], []>} : vector<2x128xbf16>, vector<128x256xbf16>, vector<2x256xf32> -> vector<2x256xf32>
    %c0_20 = arith.constant 0 : index
    %c0_21 = arith.constant 0 : index
    %24 = vector.load %arg10[%c0_20, %c0_21] : memref<1x256xf32, #tpu.memory_space<vmem>>, vector<1x256xf32>
    %25 = vector.broadcast %24 : vector<1x256xf32> to vector<2x256xf32>
    %26 = arith.addf %23, %25 : vector<2x256xf32>
    %27 = vector.extract_strided_slice %26 {offsets = [0, 0], sizes = [2, 128], strides = [1, 1]} : vector<2x256xf32> to vector<2x128xf32>
    %28 = vector.extract_strided_slice %26 {offsets = [0, 128], sizes = [2, 128], strides = [1, 1]} : vector<2x256xf32> to vector<2x128xf32>
    %c0_22 = arith.constant 0 : index
    %c0_23 = arith.constant 0 : index
    %29 = vector.load %arg19[%c0_22, %c0_23] : memref<2x128xf32, #tpu.memory_space<vmem>>, vector<2x128xf32>
    tpu.vector_store %arg19[%c0_22, %c0_23], %27 {strides = array<i32>} : memref<2x128xf32, #tpu.memory_space<vmem>>, vector<2x128xf32>,
    %c0_24 = arith.constant 0 : index
    %c0_25 = arith.constant 0 : index
    %30 = vector.load %arg20[%c0_24, %c0_25] : memref<2x128xf32, #tpu.memory_space<vmem>>, vector<2x128xf32>
    tpu.vector_store %arg20[%c0_24, %c0_25], %28 {strides = array<i32>} : memref<2x128xf32, #tpu.memory_space<vmem>>, vector<2x128xf32>,
    %c0_26 = arith.constant 0 : index
    %c0_27 = arith.constant 0 : index
    %31 = vector.load %arg3[%c0_26, %c0_27] : memref<2x128xf32, #tpu.memory_space<vmem>>, vector<2x128xf32>
    %cst_28 = arith.constant 5.000000e-01 : f32
    %32 = vector.broadcast %cst_28 : f32 to vector<2x128xf32>
    %33 = arith.mulf %32, %28 : vector<2x128xf32>
    %34 = math.exp %33 : vector<2x128xf32>
    %35 = arith.mulf %31, %34 : vector<2x128xf32>
    %36 = arith.addf %27, %35 : vector<2x128xf32>
    %37 = arith.truncf %36 : vector<2x128xf32> to vector<2x128xbf16>
    %c0_29 = arith.constant 0 : index
    %c0_30 = arith.constant 0 : index
    %38 = vector.load %arg11[%c0_29, %c0_30] : memref<128x128xbf16, #tpu.memory_space<vmem>>, vector<128x128xbf16>
    %cst_31 = arith.constant dense<0.000000e+00> : vector<2x128xf32>
    %39 = tpu.matmul %37, %38, %cst_31 {dimension_numbers = #tpu.dot_dimension_numbers<[1], [0], [0], [1], [0, 0, 1, 1], [], []>} : vector<2x128xbf16>, vector<128x128xbf16>, vector<2x128xf32> -> vector<2x128xf32>
    %c0_32 = arith.constant 0 : index
    %c0_33 = arith.constant 0 : index
    %40 = vector.load %arg12[%c0_32, %c0_33] : memref<128x128xbf16, #tpu.memory_space<vmem>>, vector<128x128xbf16>
    %cst_34 = arith.constant dense<0.000000e+00> : vector<2x128xf32>
    %41 = tpu.matmul %2, %40, %cst_34 {dimension_numbers = #tpu.dot_dimension_numbers<[1], [0], [0], [1], [0, 0, 1, 1], [], []>} : vector<2x128xbf16>, vector<128x128xbf16>, vector<2x128xf32> -> vector<2x128xf32>
    %42 = arith.addf %39, %41 : vector<2x128xf32>
    %c0_35 = arith.constant 0 : index
    %c0_36 = arith.constant 0 : index
    %43 = vector.load %arg13[%c0_35, %c0_36] : memref<1x128xf32, #tpu.memory_space<vmem>>, vector<1x128xf32>
    %44 = vector.broadcast %43 : vector<1x128xf32> to vector<2x128xf32>
    %45 = arith.addf %42, %44 : vector<2x128xf32>
    %cst_37 = arith.constant 0.000000e+00 : f32
    %46 = vector.broadcast %cst_37 : f32 to vector<2x128xf32>
    %47 = arith.maximumf %45, %46 : vector<2x128xf32>
    %48 = arith.truncf %47 : vector<2x128xf32> to vector<2x128xbf16>
    %c0_38 = arith.constant 0 : index
    %c0_39 = arith.constant 0 : index
    %49 = vector.load %arg14[%c0_38, %c0_39] : memref<128x128xbf16, #tpu.memory_space<vmem>>, vector<128x128xbf16>
    %cst_40 = arith.constant dense<0.000000e+00> : vector<2x128xf32>
    %50 = tpu.matmul %48, %49, %cst_40 {dimension_numbers = #tpu.dot_dimension_numbers<[1], [0], [0], [1], [0, 0, 1, 1], [], []>} : vector<2x128xbf16>, vector<128x128xbf16>, vector<2x128xf32> -> vector<2x128xf32>
    %c0_41 = arith.constant 0 : index
    %c0_42 = arith.constant 0 : index
    %51 = vector.load %arg15[%c0_41, %c0_42] : memref<1x128xf32, #tpu.memory_space<vmem>>, vector<1x128xf32>
    %52 = vector.broadcast %51 : vector<1x128xf32> to vector<2x128xf32>
    %53 = arith.addf %50, %52 : vector<2x128xf32>
    %cst_43 = arith.constant 0.000000e+00 : f32
    %54 = vector.broadcast %cst_43 : f32 to vector<2x128xf32>
    %55 = arith.maximumf %53, %54 : vector<2x128xf32>
    %56 = arith.truncf %55 : vector<2x128xf32> to vector<2x128xbf16>
    %c0_44 = arith.constant 0 : index
    %c0_45 = arith.constant 0 : index
    %57 = vector.load %arg16[%c0_44, %c0_45] : memref<128x128xbf16, #tpu.memory_space<vmem>>, vector<128x128xbf16>
    %cst_46 = arith.constant dense<0.000000e+00> : vector<2x128xf32>
    %58 = tpu.matmul %56, %57, %cst_46 {dimension_numbers = #tpu.dot_dimension_numbers<[1], [0], [0], [1], [0, 0, 1, 1], [], []>} : vector<2x128xbf16>, vector<128x128xbf16>, vector<2x128xf32> -> vector<2x128xf32>
    %c0_47 = arith.constant 0 : index
    %c0_48 = arith.constant 0 : index
    %59 = vector.load %arg17[%c0_47, %c0_48] : memref<1x128xf32, #tpu.memory_space<vmem>>, vector<1x128xf32>
    %60 = vector.broadcast %59 : vector<1x128xf32> to vector<2x128xf32>
    %61 = arith.addf %58, %60 : vector<2x128xf32>
    %cst_49 = arith.constant 0.000000e+00 : f32
    %62 = vector.broadcast %cst_49 : f32 to vector<2x128xf32>
    %63 = arith.subf %62, %61 : vector<2x128xf32>
    %64 = math.exp %63 : vector<2x128xf32>
    %cst_50 = arith.constant 1.000000e+00 : f32
    %65 = vector.broadcast %cst_50 : f32 to vector<2x128xf32>
    %66 = arith.addf %65, %64 : vector<2x128xf32>
    %67 = tpu.reciprocal %66 {approx = true} : vector<2x128xf32> -> vector<2x128xf32>
    %c0_51 = arith.constant 0 : index
    %c0_52 = arith.constant 0 : index
    %68 = vector.load %arg18[%c0_51, %c0_52] : memref<2x128xf32, #tpu.memory_space<vmem>>, vector<2x128xf32>
    tpu.vector_store %arg18[%c0_51, %c0_52], %67 {strides = array<i32>} : memref<2x128xf32, #tpu.memory_space<vmem>>, vector<2x128xf32>,
    return
  }
  func.func @transform_0(%arg0: i32) -> (i32, i32) {
    %c0_i32 = arith.constant 0 : i32
    %c0_i32_0 = arith.constant 0 : i32
    return %arg0, %c0_i32 : i32, i32
  }
  func.func @transform_1(%arg0: i32) -> (i32, i32) {
    %c0_i32 = arith.constant 0 : i32
    %c0_i32_0 = arith.constant 0 : i32
    return %arg0, %c0_i32 : i32, i32
  }
  func.func @transform_2(%arg0: i32) -> (i32, i32) {
    %c0_i32 = arith.constant 0 : i32
    %c0_i32_0 = arith.constant 0 : i32
    return %arg0, %c0_i32 : i32, i32
  }
  func.func @transform_3(%arg0: i32) -> (i32, i32) {
    %c0_i32 = arith.constant 0 : i32
    %c0_i32_0 = arith.constant 0 : i32
    %c0_i32_1 = arith.constant 0 : i32
    return %c0_i32, %c0_i32_0 : i32, i32
  }
  func.func @transform_4(%arg0: i32) -> (i32, i32) {
    %c0_i32 = arith.constant 0 : i32
    %c0_i32_0 = arith.constant 0 : i32
    %c0_i32_1 = arith.constant 0 : i32
    return %c0_i32, %c0_i32_0 : i32, i32
  }
  func.func @transform_5(%arg0: i32) -> (i32, i32) {
    %c0_i32 = arith.constant 0 : i32
    %c0_i32_0 = arith.constant 0 : i32
    %c0_i32_1 = arith.constant 0 : i32
    return %c0_i32, %c0_i32_0 : i32, i32
  }
  func.func @transform_6(%arg0: i32) -> (i32, i32) {
    %c0_i32 = arith.constant 0 : i32
    %c0_i32_0 = arith.constant 0 : i32
    %c0_i32_1 = arith.constant 0 : i32
    return %c0_i32, %c0_i32_0 : i32, i32
  }
  func.func @transform_7(%arg0: i32) -> (i32, i32) {
    %c0_i32 = arith.constant 0 : i32
    %c0_i32_0 = arith.constant 0 : i32
    %c0_i32_1 = arith.constant 0 : i32
    return %c0_i32, %c0_i32_0 : i32, i32
  }
  func.func @transform_8(%arg0: i32) -> (i32, i32) {
    %c0_i32 = arith.constant 0 : i32
    %c0_i32_0 = arith.constant 0 : i32
    %c0_i32_1 = arith.constant 0 : i32
    return %c0_i32, %c0_i32_0 : i32, i32
  }
  func.func @transform_9(%arg0: i32) -> (i32, i32) {
    %c0_i32 = arith.constant 0 : i32
    %c0_i32_0 = arith.constant 0 : i32
    %c0_i32_1 = arith.constant 0 : i32
    return %c0_i32, %c0_i32_0 : i32, i32
  }
  func.func @transform_10(%arg0: i32) -> (i32, i32) {
    %c0_i32 = arith.constant 0 : i32
    %c0_i32_0 = arith.constant 0 : i32
    %c0_i32_1 = arith.constant 0 : i32
    return %c0_i32, %c0_i32_0 : i32, i32
  }
  func.func @transform_11(%arg0: i32) -> (i32, i32) {
    %c0_i32 = arith.constant 0 : i32
    %c0_i32_0 = arith.constant 0 : i32
    %c0_i32_1 = arith.constant 0 : i32
    return %c0_i32, %c0_i32_0 : i32, i32
  }
  func.func @transform_12(%arg0: i32) -> (i32, i32) {
    %c0_i32 = arith.constant 0 : i32
    %c0_i32_0 = arith.constant 0 : i32
    %c0_i32_1 = arith.constant 0 : i32
    return %c0_i32, %c0_i32_0 : i32, i32
  }
  func.func @transform_13(%arg0: i32) -> (i32, i32) {
    %c0_i32 = arith.constant 0 : i32
    %c0_i32_0 = arith.constant 0 : i32
    %c0_i32_1 = arith.constant 0 : i32
    return %c0_i32, %c0_i32_0 : i32, i32
  }
  func.func @transform_14(%arg0: i32) -> (i32, i32) {
    %c0_i32 = arith.constant 0 : i32
    %c0_i32_0 = arith.constant 0 : i32
    %c0_i32_1 = arith.constant 0 : i32
    return %c0_i32, %c0_i32_0 : i32, i32
  }
  func.func @transform_15(%arg0: i32) -> (i32, i32) {
    %c0_i32 = arith.constant 0 : i32
    %c0_i32_0 = arith.constant 0 : i32
    %c0_i32_1 = arith.constant 0 : i32
    return %c0_i32, %c0_i32_0 : i32, i32
  }
  func.func @transform_16(%arg0: i32) -> (i32, i32) {
    %c0_i32 = arith.constant 0 : i32
    %c0_i32_0 = arith.constant 0 : i32
    %c0_i32_1 = arith.constant 0 : i32
    return %c0_i32, %c0_i32_0 : i32, i32
  }
  func.func @transform_17(%arg0: i32) -> (i32, i32) {
    %c0_i32 = arith.constant 0 : i32
    %c0_i32_0 = arith.constant 0 : i32
    return %arg0, %c0_i32 : i32, i32
  }
  func.func @transform_18(%arg0: i32) -> (i32, i32) {
    %c0_i32 = arith.constant 0 : i32
    %c0_i32_0 = arith.constant 0 : i32
    return %arg0, %c0_i32 : i32, i32
  }
  func.func @transform_19(%arg0: i32) -> (i32, i32) {
    %c0_i32 = arith.constant 0 : i32
    %c0_i32_0 = arith.constant 0 : i32
    return %arg0, %c0_i32 : i32, i32
  }
}

</mosaic_0001>

<bundles_post_ra>
// kernel: tpu_custom_call.1
= control target key start
LH: loop header
LB: loop body
LE: loop exit
PB: predicated region body
PF: predicated region fallthrough
CT: control target
= control target key end

     0   :  { %s2118_s0 = inlined_call_operand.hbm [shape: bf16[2,128], index: 0, kind: input, shape index: {}]   ;;  %s2119_s1 = inlined_call_operand.hbm [shape: f32[2,128], index: 1, kind: input, shape index: {}]   ;;  %s2120_s2 = inlined_call_operand.vmem [shape: f32[2,128], index: 2, kind: input, shape index: {}]   ;;  %s2121_s3 = inlined_call_operand.hbm [shape: bf16[128,128], index: 3, kind: input, shape index: {}]   ;;  %s2122_s4 = inlined_call_operand.hbm [shape: bf16[128,128], index: 4, kind: input, shape index: {}]   ;;  %s2123_s5 = inlined_call_operand.vmem [shape: f32[1,128], index: 5, kind: input, shape index: {}]   ;;  %s2124_s6 = inlined_call_operand.hbm [shape: bf16[128,128], index: 6, kind: input, shape index: {}]   ;;  %s2125_s7 = inlined_call_operand.vmem [shape: f32[1,128], index: 7, kind: input, shape index: {}]   ;;  %s2126_s8 = inlined_call_operand.hbm [shape: bf16[128,256], index: 8, kind: input, shape index: {}]   ;;  %s2127_s9 = inlined_call_operand.vmem [shape: f32[1,256], index: 9, kind: input, shape index: {}]   ;;  %s2128_s10 = inlined_call_operand.hbm [shape: bf16[128,128], index: 10, kind: input, shape index: {}]   ;;  %s2129_s11 = inlined_call_operand.hbm [shape: bf16[128,128], index: 11, kind: input, shape index: {}]   ;;  %s2130_s12 = inlined_call_operand.vmem [shape: f32[1,128], index: 12, kind: input, shape index: {}]   ;;  %s2131_s13 = inlined_call_operand.hbm [shape: bf16[128,128], index: 13, kind: input, shape index: {}]   ;;  %s2132_s14 = inlined_call_operand.vmem [shape: f32[1,128], index: 14, kind: input, shape index: {}]   ;;  %s2133_s15 = inlined_call_operand.hbm [shape: bf16[128,128], index: 15, kind: input, shape index: {}]   ;;  %s2134_s16 = inlined_call_operand.vmem [shape: f32[1,128], index: 16, kind: input, shape index: {}]   ;;  %s2135_s17 = inlined_call_operand.hbm [shape: f32[2,128], index: 17, kind: output, shape index: {0}]   ;;  %s2136_s18 = inlined_call_operand.hbm [shape: f32[2,128], index: 18, kind: output, shape index: {1}]   ;;  %s2137_s19 = inlined_call_operand.hbm [shape: f32[2,128], index: 19, kind: output, shape index: {2}]  }
   0x1   :  { %2138 = sst [smem:[#allocation31_spill]] %s2118_s0 }
   0x2   :  { %2139 = sst [smem:[#allocation32_spill]] %s2119_s1 }
   0x3   :  { %2140 = sst [smem:[#allocation33_spill]] %s2120_s2 }
   0x4   :  { %2141 = sst [smem:[#allocation34_spill]] %s2121_s3 }
   0x5   :  { %25 = vsyncpa [#allocation3], 0 }
   0x6   :  { %26 = vsyncpa [#allocation6], 0 }
   0x7   :  { %27 = vsyncpa [#allocation9], 0 }
   0x8   :  { %28 = vsyncpa [#allocation12], 0 }
   0x9   :  { %29 = vsyncpa [#allocation15], 0 }
   0xa   :  { %30 = vsyncpa [#allocation18], 0 }
   0xb   :  { %31 = vsyncpa [#allocation4], 0 }
   0xc   :  { %32 = vsyncpa [#allocation21], 0  ;;  %s1843_s0 = smov [#allocation5]  }
   0xd   :  { %s49_s30 = sshll.u32 %s1843_s0, 4  ;;  %s50_s30 = int_to_ptr.vmem [resolvable:$true] %s49_s30 }
   0xe   :  { %s1575_s20 = scalar_lea.vmem %s50_s30, 32  ;;  %p1580_p1 = scmp.lt.s32.totalorder %s50_s30, %s50_s30 }
   0xf   :  { %p1576_p0 = scmp.ne.s32.totalorder %s50_s30, %s1575_s20  ;;  %p1581_p2 = scmp.lt.s32.totalorder %s1575_s20, %s1575_s20 }
  0x11   :  { %p1582_p3 = por %p1581_p2, %p1580_p1 }
  0x13   :  { %p1583_p4 = pnand %p1582_p3, %p1576_p0 }
  0x15   :  { %1586 = shalt.err (!%p1583_p4)
}
  0x16   :  { %s2142_s22 = sld [smem:[#allocation32_spill]]  ;;  %s1844_s2 = smov [#allocation8]  }
  0x17   :  { %s72_s23 = sshll.u32 %s1844_s2, 4  ;;  %s1845_s24 = smov [#allocation11]   ;;  %s73_s23 = int_to_ptr.vmem [resolvable:$true] %s72_s23 }
  0x18   :  { %s100_s25 = sshll.u32 %s1845_s24, 4  ;;  %s1595_s3 = scalar_lea.vmem %s73_s23, 1024  ;;  %s101_s25 = int_to_ptr.vmem [resolvable:$true] %s100_s25 }
  0x19   :  { %p1596_p5 = scmp.ne.s32.totalorder %s73_s23, %s1595_s3  ;;  %p1600_p6 = scmp.lt.s32.totalorder %s73_s23, %s73_s23 }
  0x1a   :  { %p1601_p7 = scmp.lt.s32.totalorder %s1595_s3, %s1595_s3 }
  0x1c   :  { %52 = dma.hbm_to_vmem [thread:$0]  %s2142_s22, 32, %s50_s30, [#allocation6]  }
  0x1d   :  { %p1602_p8 = por %p1601_p7, %p1600_p6 }
  0x1f   :  { %p1603_p9 = pnand %p1602_p8, %p1596_p5 }
  0x21   :  { %1606 = shalt.err (!%p1603_p9)
}
  0x22   :  { %s1846_s26 = smov 64   ;;  %s1847_s27 = smov 4  }
  0x23   :  { %78 = dma.hbm_to_vmem [thread:$0]  %s2122_s4, 1024, %s73_s23, [#allocation9], %s1846_s26, %s1846_s26, %s1847_s27  }
  0x24   :  { %s1615_s0 = scalar_lea.vmem %s101_s25, 2048  ;;  %p1620_p11 = scmp.lt.s32.totalorder %s101_s25, %s101_s25 }
  0x25   :  { %p1616_p10 = scmp.ne.s32.totalorder %s101_s25, %s1615_s0  ;;  %p1621_p12 = scmp.lt.s32.totalorder %s1615_s0, %s1615_s0 }
  0x27   :  { %p1622_p13 = por %p1621_p12, %p1620_p11 }
  0x29   :  { %p1623_p0 = pnand %p1622_p13, %p1616_p10 }
  0x2b   :  { %1626 = shalt.err (!%p1623_p0)
}
  0x2c   :  { %s1848_s30 = smov 128   ;;  %s1849_s20 = smov 8  }
  0x2d   :  { %106 = dma.hbm_to_vmem [thread:$0]  %s2126_s8, 2048, %s101_s25, [#allocation12], %s1848_s30, %s1848_s30, %s1849_s20  }
  0x2e   :  { %s1850_s22 = smov [#allocation14]   ;;  %s1851_s24 = smov [#allocation2]  }
  0x2f   :  { %s126_s2 = sshll.u32 %s1850_s22, 4  ;;  %s39_s3 = sshll.u32 %s1851_s24, 4  ;;  %s127_s2 = int_to_ptr.vmem [resolvable:$true] %s126_s2  ;;  %s40_s3 = int_to_ptr.vmem [resolvable:$true] %s39_s3 }
  0x30   :  { %s1635_s4 = scalar_lea.vmem %s127_s2, 1024  ;;  %p1640_p2 = scmp.lt.s32.totalorder %s127_s2, %s127_s2 }
  0x31   :  { %p1636_p1 = scmp.ne.s32.totalorder %s127_s2, %s1635_s4  ;;  %p1641_p3 = scmp.lt.s32.totalorder %s1635_s4, %s1635_s4 }
  0x33   :  { %p1642_p4 = por %p1641_p3, %p1640_p2 }
  0x35   :  { %p1643_p5 = pnand %p1642_p4, %p1636_p1 }
  0x37   :  { %1646 = shalt.err (!%p1643_p5)
}
  0x38   :  { %132 = dma.hbm_to_vmem [thread:$0]  %s2129_s11, 1024, %s127_s2, [#allocation15], %s1846_s26, %s1846_s26, %s1847_s27  }
  0x39   :  { %s1655_s8 = scalar_lea.vmem %s40_s3, 16  ;;  %s1659_s25 = scalar_lea.vmem %s40_s3, 32 }
  0x3a   :  { %p1656_p6 = scmp.ne.s32.totalorder %s40_s3, %s1655_s8  ;;  %p1660_p7 = scmp.lt.s32.totalorder %s40_s3, %s40_s3 }
  0x3b   :  { %p1661_p8 = scmp.lt.s32.totalorder %s1659_s25, %s1655_s8 }
  0x3d   :  { %p1662_p9 = por %p1661_p8, %p1660_p7 }
  0x3f   :  { %p1663_p10 = pnand %p1662_p9, %p1656_p6 }
  0x41   :  { %1666 = shalt.err (!%p1663_p10)
}
  0x42   :  { %s2143_s30 = sld [smem:[#allocation31_spill]]  ;;  %s1852_s20 = smov [#allocation7]  }
  0x43   :  { %s60_s21 = sshll.u32 %s1852_s20, 4  ;;  %s1853_s1 = smov [#allocation10]   ;;  %s61_s21 = int_to_ptr.vmem [resolvable:$true] %s60_s21 }
  0x44   :  { %s86_s22 = sshll.u32 %s1853_s1, 4  ;;  %s1675_s24 = scalar_lea.vmem %s61_s21, 1024  ;;  %s87_s22 = int_to_ptr.vmem [resolvable:$true] %s86_s22 }
  0x45   :  { %p1676_p11 = scmp.ne.s32.totalorder %s61_s21, %s1675_s24  ;;  %p1680_p12 = scmp.lt.s32.totalorder %s61_s21, %s61_s21 }
  0x46   :  { %p1681_p13 = scmp.lt.s32.totalorder %s1675_s24, %s1675_s24 }
  0x48   :  { %42 = dma.hbm_to_vmem [thread:$0]  %s2143_s30, 16, %s40_s3, [#allocation3]  }
  0x49   :  { %p1682_p0 = por %p1681_p13, %p1680_p12 }
  0x4b   :  { %p1683_p1 = pnand %p1682_p0, %p1676_p11 }
  0x4d   :  { %1686 = shalt.err (!%p1683_p1)
}
  0x4e   :  { %s2144_s4 = sld [smem:[#allocation34_spill]]  ;;  %s1695_s3 = scalar_lea.vmem %s87_s22, 1024 }
  0x4f   :  { %p1696_p2 = scmp.ne.s32.totalorder %s87_s22, %s1695_s3  ;;  %p1700_p3 = scmp.lt.s32.totalorder %s87_s22, %s87_s22 }
  0x50   :  { %p1701_p4 = scmp.lt.s32.totalorder %s1695_s3, %s1695_s3 }
  0x52   :  { %p1702_p5 = por %p1701_p4, %p1700_p3 }
  0x54   :  { %66 = dma.hbm_to_vmem [thread:$0]  %s2144_s4, 1024, %s61_s21, [#allocation6], %s1846_s26, %s1846_s26, %s1847_s27  }
  0x55   :  { %p1703_p6 = pnand %p1702_p5, %p1696_p2 }
  0x57   :  { %1706 = shalt.err (!%p1703_p6)
}
  0x58   :  { %92 = dma.hbm_to_vmem [thread:$0]  %s2124_s6, 1024, %s87_s22, [#allocation9], %s1846_s26, %s1846_s26, %s1847_s27  }
  0x59   :  { %s1854_s8 = smov [#allocation13]   ;;  %s1855_s29 = smov [#allocation16]  }
  0x5a   :  { %s114_s25 = sshll.u32 %s1854_s8, 4  ;;  %s140_s0 = sshll.u32 %s1855_s29, 4  ;;  %s115_s25 = int_to_ptr.vmem [resolvable:$true] %s114_s25  ;;  %s141_s0 = int_to_ptr.vmem [resolvable:$true] %s140_s0 }
  0x5b   :  { %s1715_s30 = scalar_lea.vmem %s115_s25, 1024  ;;  %p1720_p8 = scmp.lt.s32.totalorder %s115_s25, %s115_s25 }
  0x5c   :  { %p1716_p7 = scmp.ne.s32.totalorder %s115_s25, %s1715_s30  ;;  %p1721_p9 = scmp.lt.s32.totalorder %s1715_s30, %s1715_s30 }
  0x5e   :  { %p1722_p10 = por %p1721_p9, %p1720_p8 }
  0x60   :  { %p1723_p11 = pnand %p1722_p10, %p1716_p7 }
  0x62   :  { %1726 = shalt.err (!%p1723_p11)
}
  0x63   :  { %120 = dma.hbm_to_vmem [thread:$0]  %s2128_s10, 1024, %s115_s25, [#allocation12], %s1846_s26, %s1846_s26, %s1847_s27  }
  0x64   :  { %s1735_s6 = scalar_lea.vmem %s141_s0, 1024  ;;  %p1740_p13 = scmp.lt.s32.totalorder %s141_s0, %s141_s0 }
  0x65   :  { %p1736_p12 = scmp.ne.s32.totalorder %s141_s0, %s1735_s6  ;;  %p1741_p0 = scmp.lt.s32.totalorder %s1735_s6, %s1735_s6 }
  0x67   :  { %p1742_p1 = por %p1741_p0, %p1740_p13 }
  0x69   :  { %p1743_p2 = pnand %p1742_p1, %p1736_p12 }
  0x6b   :  { %1746 = shalt.err (!%p1743_p2)
}
  0x6c   :  { %146 = dma.hbm_to_vmem [thread:$0]  %s2131_s13, 1024, %s141_s0, [#allocation15], %s1846_s26, %s1846_s26, %s1847_s27  }
  0x6d   :  { %s1856_s24 = smov [#allocation17]  }
  0x6e   :  { %s154_s11 = sshll.u32 %s1856_s24, 4  ;;  %s155_s11 = int_to_ptr.vmem [resolvable:$true] %s154_s11 }
  0x6f   :  { %s1755_s2 = scalar_lea.vmem %s155_s11, 1024  ;;  %p1760_p4 = scmp.lt.s32.totalorder %s155_s11, %s155_s11 }
  0x70   :  { %p1756_p3 = scmp.ne.s32.totalorder %s155_s11, %s1755_s2  ;;  %p1761_p5 = scmp.lt.s32.totalorder %s1755_s2, %s1755_s2 }
  0x72   :  { %p1762_p6 = por %p1761_p5, %p1760_p4 }
  0x74   :  { %p1763_p7 = pnand %p1762_p6, %p1756_p3 }
  0x76   :  { %1766 = shalt.err (!%p1763_p7)
}
  0x77   :  { %160 = dma.hbm_to_vmem [thread:$0]  %s2133_s15, 1024, %s155_s11, [#allocation18], %s1846_s26, %s1846_s26, %s1847_s27  }
  0x78   :  { %1827 = dma.done.wait [#allocation3], 16  }
  0x79   :  { %1828 = vsyncadd [#allocation3], 4294967280 }
  0x7a   :  { %1829 = dma.done.wait [#allocation6], 1056  }
  0x7b   :  { %1830 = vsyncadd [#allocation6], 4294966240 }
  0x7c   :  { %1831 = dma.done.wait [#allocation9], 2048  }
  0x7d   :  { %1832 = vsyncadd [#allocation9], 4294965248 }
  0x7e   :  { %1833 = dma.done.wait [#allocation12], 3072  }
  0x7f   :  { %1834 = vsyncadd [#allocation12], 4294964224 }
  0x80   :  { %1835 = dma.done.wait [#allocation15], 2048  }
  0x81   :  { %1836 = vsyncadd [#allocation15], 4294965248 }
  0x82   :  { %1837 = dma.done.wait [#allocation18], 1024  }
  0x83   :  { %1838 = vsyncadd [#allocation18], 4294966272  ;;  %v1857_v0 = vmov 0.0   ;;  %vm1858_vm0 = vmmov 0   ;;  %v1481_v1 = vld [vmem:[#allocation8 + $0x38] sm:$0xff]   ;;  %v1483_v3 = vld [vmem:[#allocation8 + $0x30] sm:$0xff]  }
  0x84   :  { %1321 = vmatprep.subr.bf16.mxu0 %v1857_v0  ;;  %1341 = vmatprep.subr.bf16.mxu1 %v1857_v0  ;;  %v1482_v2 = vld [vmem:[#allocation7 + $0x38] sm:$0xff]   ;;  %v1484_v4 = vld [vmem:[#allocation7 + $0x30] sm:$0xff]   ;;  %v1485_v5 = vld [vmem:[#allocation8 + $0x28] sm:$0xff]   ;;  %v1859_v57 = vmov 0   ;;  %s2145_s28 = sld [smem:[#allocation33_spill]] }
  0x85   :  { %1337 = vmatprep.mubr.msk.bf16.mxu0 %vm1858_vm0, %v1857_v0  ;;  %1357 = vmatprep.mubr.msk.bf16.mxu1 %vm1858_vm0, %v1857_v0  ;;  %v1486_v6 = vld [vmem:[#allocation7 + $0x28] sm:$0xff]   ;;  %v1487_v7 = vld [vmem:[#allocation8 + $0x20] sm:$0xff]   ;;  %v1489_v9 = vld [vmem:[#allocation8 + $0x18] sm:$0xff]  }
  0x86   :  { %1322 = vmatpush3.bf16.msra.mxu0 %v1481_v1  ;;  %1342 = vmatpush3.bf16.msra.mxu1 %v1482_v2  ;;  %v1488_v8 = vld [vmem:[#allocation7 + $0x20] sm:$0xff]   ;;  %v1490_v10 = vld [vmem:[#allocation7 + $0x18] sm:$0xff]   ;;  %v1491_v11 = vld [vmem:[#allocation8 + $0x10] sm:$0xff]  }
  0x87   :  { %1323 = vmatprep.subr.bf16.mxu0 %v1857_v0  ;;  %1343 = vmatprep.subr.bf16.mxu1 %v1857_v0  ;;  %v1492_v12 = vld [vmem:[#allocation7 + $0x10] sm:$0xff]   ;;  %v1493_v13 = vld [vmem:[#allocation8 + $0x8] sm:$0xff]   ;;  %v1495_v15 = vld [vmem:[#allocation8] sm:$0xff]  }
  0x88   :  { %v1494_v14 = vld [vmem:[#allocation7 + $0x8] sm:$0xff]   ;;  %v195_v16 = vld [vmem:[#allocation5] sm:$0x3]  ;;  %v1496_v17 = vld [vmem:[#allocation7] sm:$0xff]  }
  0x89   :  { %v1497_v18 = vld [vmem:[#allocation10 + $0x38] sm:$0xff]   ;;  %v2034_v19 = vpack.c.bf16 %v195_v16, %v195_v16  ;;  %v1498_v21 = vld [vmem:[#allocation10 + $0x30] sm:$0xff]   ;;  %v1499_v22 = vld [vmem:[#allocation10 + $0x28] sm:$0xff]  }
  0x8a   :  { %1324 = vmatpush3.bf16.msra.mxu0 %v1483_v3  ;;  %1344 = vmatpush3.bf16.msra.mxu1 %v1484_v4  ;;  %v194_v20 = vld [vmem:[#allocation2] sm:$0x1]  ;;  %v1500_v23 = vld [vmem:[#allocation10 + $0x20] sm:$0xff]   ;;  %v1502_v25 = vld [vmem:[#allocation10 + $0x10] sm:$0xff]  }
  0x8b   :  { %1325 = vmatprep.subr.bf16.mxu0 %v1857_v0  ;;  %1345 = vmatprep.subr.bf16.mxu1 %v1857_v0  ;;  %v1501_v24 = vld [vmem:[#allocation10 + $0x18] sm:$0xff]   ;;  %v1503_v26 = vld [vmem:[#allocation10 + $0x8] sm:$0xff]   ;;  %v1504_v27 = vld [vmem:[#allocation10] sm:$0xff]  }
  0x8c   :  { %v1505_v28 = vld [vmem:[#allocation11 + $0x70] ss:$8 sps:$4 sm:$0xff]   ;;  %v1507_v29 = vld [vmem:[#allocation11 + $0x74] ss:$8 sps:$4 sm:$0xff]   ;;  %v1510_v30 = vld [vmem:[#allocation11 + $0x64] ss:$8 sps:$4 sm:$0xff]  }
  0x8d   :  { %v1508_v31 = vld [vmem:[#allocation11 + $0x60] ss:$8 sps:$4 sm:$0xff]   ;;  %v1513_v32 = vld [vmem:[#allocation11 + $0x54] ss:$8 sps:$4 sm:$0xff]   ;;  %v1511_v33 = vld [vmem:[#allocation11 + $0x50] ss:$8 sps:$4 sm:$0xff]  }
  0x8e   :  { %1326 = vmatpush3.bf16.msra.mxu0 %v1485_v5  ;;  %1346 = vmatpush3.bf16.msra.mxu1 %v1486_v6  ;;  %v1516_v34 = vld [vmem:[#allocation11 + $0x44] ss:$8 sps:$4 sm:$0xff]   ;;  %v1514_v35 = vld [vmem:[#allocation11 + $0x40] ss:$8 sps:$4 sm:$0xff]   ;;  %v1519_v36 = vld [vmem:[#allocation11 + $0x34] ss:$8 sps:$4 sm:$0xff]  }
  0x8f   :  { %1327 = vmatprep.subr.bf16.mxu0 %v1857_v0  ;;  %1347 = vmatprep.subr.bf16.mxu1 %v1857_v0  ;;  %v1517_v37 = vld [vmem:[#allocation11 + $0x30] ss:$8 sps:$4 sm:$0xff]   ;;  %v1522_v38 = vld [vmem:[#allocation11 + $0x24] ss:$8 sps:$4 sm:$0xff]   ;;  %v1520_v39 = vld [vmem:[#allocation11 + $0x20] ss:$8 sps:$4 sm:$0xff]  }
  0x90   :  { %v1525_v40 = vld [vmem:[#allocation11 + $0x14] ss:$8 sps:$4 sm:$0xff]   ;;  %v1523_v41 = vld [vmem:[#allocation11 + $0x10] ss:$8 sps:$4 sm:$0xff]   ;;  %v1528_v55 = vld [vmem:[#allocation11 + $0x4] ss:$8 sps:$4 sm:$0xff]  }
  0x91   :  { %v1197_v44 = vld [vmem:[%s2123_s5] ss:$0 sm:$0xff]  ;;  %v1526_v56 = vld [vmem:[#allocation11] ss:$8 sps:$4 sm:$0xff]   ;;  %v1530_v59 = vld [vmem:[#allocation14 + $0x30] sm:$0xff]  }
  0x92   :  { %1328 = vmatpush3.bf16.msra.mxu0 %v1487_v7  ;;  %1348 = vmatpush3.bf16.msra.mxu1 %v1488_v8  ;;  %v1529_v58 = vld [vmem:[#allocation14 + $0x38] sm:$0xff]   ;;  %v1532_v6 = vld [vmem:[#allocation14 + $0x28] sm:$0xff]   ;;  %v1533_v7 = vld [vmem:[#allocation13 + $0x30] sm:$0xff]  }
  0x93   :  { %1329 = vmatprep.subr.bf16.mxu0 %v1857_v0  ;;  %1349 = vmatprep.subr.bf16.mxu1 %v1857_v0  ;;  %v1198_v60 = vld [vmem:[%s2125_s7] ss:$0 sm:$0xff]  ;;  %v1534_v8 = vld [vmem:[#allocation14 + $0x20] sm:$0xff]  }
  0x94   :  { %v1531_v3 = vld [vmem:[#allocation13 + $0x38] sm:$0xff]   ;;  %v1542_v16 = vld [vmem:[#allocation14] sm:$0xff]  }
  0x96   :  { %1330 = vmatpush3.bf16.msra.mxu0 %v1489_v9  ;;  %1350 = vmatpush3.bf16.msra.mxu1 %v1490_v10  ;;  %v1535_v9 = vld [vmem:[#allocation13 + $0x28] sm:$0xff]   ;;  %v1536_v10 = vld [vmem:[#allocation14 + $0x18] sm:$0xff]  }
  0x97   :  { %1331 = vmatprep.subr.bf16.mxu0 %v1857_v0  ;;  %1351 = vmatprep.subr.bf16.mxu1 %v1857_v0 }
  0x9a   :  { %1332 = vmatpush3.bf16.msra.mxu0 %v1491_v11  ;;  %1352 = vmatpush3.bf16.msra.mxu1 %v1492_v12  ;;  %v1537_v11 = vld [vmem:[#allocation13 + $0x20] sm:$0xff]   ;;  %v1538_v12 = vld [vmem:[#allocation14 + $0x10] sm:$0xff]  }
  0x9b   :  { %1333 = vmatprep.subr.bf16.mxu0 %v1857_v0  ;;  %1353 = vmatprep.subr.bf16.mxu1 %v1857_v0 }
  0x9e   :  { %1334 = vmatpush3.bf16.msra.mxu0 %v1493_v13  ;;  %1354 = vmatpush3.bf16.msra.mxu1 %v1494_v14  ;;  %v1539_v13 = vld [vmem:[#allocation13 + $0x18] sm:$0xff]   ;;  %v1540_v14 = vld [vmem:[#allocation14 + $0x8] sm:$0xff]  }
  0x9f   :  { %1335 = vmatprep.subr.bf16.mxu0 %v1857_v0  ;;  %1355 = vmatprep.subr.bf16.mxu1 %v1857_v0 }
  0xa2   :  { %1336 = vmatpush3.bf16.msra.mxu0 %v1495_v15  ;;  %1356 = vmatpush3.bf16.msra.mxu1 %v1496_v17  ;;  %v1541_v15 = vld [vmem:[#allocation13 + $0x10] sm:$0xff]   ;;  %v1543_v17 = vld [vmem:[#allocation13 + $0x8] sm:$0xff]  }
  0xa3   :  { %1361 = vmatprep.subr.bf16.mxu0 %v1857_v0  ;;  %636 = vmatprep.subr.bf16.mxu1 %v1507_v29 }
  0xa5   :  { %1338 = vmatmul.mubr.bf16.vlgmr.msra.gmra.mxu0 %v2034_v19  ;;  %1358 = vmatmul.mubr.bf16.vlgmr.msra.gmra.mxu1 %v194_v20  ;;  %v1545_v20 = vld [vmem:[#allocation16 + $0x38] sm:$0xff]  }
  0xa6   :  { %1362 = vmatpush3.bf16.msra.mxu0 %v1497_v18  ;;  %1377 = vmatprep.mubr.msk.bf16.mxu0 %vm1858_vm0, %v1857_v0  ;;  %v1544_v18 = vld [vmem:[#allocation13] sm:$0xff]  }
  0xa7   :  { %1363 = vmatprep.subr.bf16.mxu0 %v1857_v0  ;;  %637 = vmatpush1.bf16.msra.mxu1 %v1505_v28  ;;  %v544_v28 = vld [vmem:[%s2127_s9] sm:$0x3] }
  0xa8   :  { %638 = vmatprep.subr.bf16.mxu1 %v1510_v30  ;;  %668 = vmatprep.mubr.bf16.mxu1 %v1859_v57 }
  0xaa   :  { %1364 = vmatpush3.bf16.msra.mxu0 %v1498_v21  ;;  %v1546_v21 = vld [vmem:[#allocation16 + $0x30] sm:$0xff]  }
  0xab   :  { %1365 = vmatprep.subr.bf16.mxu0 %v1857_v0  ;;  %639 = vmatpush1.bf16.msra.mxu1 %v1508_v31 }
  0xac   :  { %640 = vmatprep.subr.bf16.mxu1 %v1513_v32 }
  0xae   :  { %1366 = vmatpush3.bf16.msra.mxu0 %v1499_v22  ;;  %v1547_v22 = vld [vmem:[#allocation16 + $0x28] sm:$0xff]  }
  0xaf   :  { %1367 = vmatprep.subr.bf16.mxu0 %v1857_v0  ;;  %641 = vmatpush1.bf16.msra.mxu1 %v1511_v33 }
  0xb0   :  { %642 = vmatprep.subr.bf16.mxu1 %v1516_v34 }
  0xb2   :  { %1368 = vmatpush3.bf16.msra.mxu0 %v1500_v23  ;;  %v1548_v23 = vld [vmem:[#allocation16 + $0x20] sm:$0xff]  }
  0xb3   :  { %1369 = vmatprep.subr.bf16.mxu0 %v1857_v0  ;;  %643 = vmatpush1.bf16.msra.mxu1 %v1514_v35 }
  0xb4   :  { %644 = vmatprep.subr.bf16.mxu1 %v1519_v36 }
  0xb6   :  { %1370 = vmatpush3.bf16.msra.mxu0 %v1501_v24  ;;  %v1550_v24 = vld [vmem:[#allocation16 + $0x10] sm:$0xff]  }
  0xb7   :  { %1371 = vmatprep.subr.bf16.mxu0 %v1857_v0  ;;  %645 = vmatpush1.bf16.msra.mxu1 %v1517_v37 }
  0xb8   :  { %646 = vmatprep.subr.bf16.mxu1 %v1522_v38 }
  0xba   :  { %1372 = vmatpush3.bf16.msra.mxu0 %v1502_v25  ;;  %v546_v25 = vlaneseq }
  0xbb   :  { %1373 = vmatprep.subr.bf16.mxu0 %v1857_v0  ;;  %647 = vmatpush1.bf16.msra.mxu1 %v1520_v39 }
  0xbc   :  { %648 = vmatprep.subr.bf16.mxu1 %v1525_v40  ;;  %v679_v40 = vld [vmem:[%s2145_s28] sm:$0x3] }
  0xbe   :  { %1374 = vmatpush3.bf16.msra.mxu0 %v1503_v26  ;;  %v547_v26 = vshrl.u32 %v546_v25, 7 }
  0xbf   :  { %1375 = vmatprep.subr.bf16.mxu0 %v1857_v0  ;;  %649 = vmatpush1.bf16.msra.mxu1 %v1523_v41 }
  0xc0   :  { %650 = vmatprep.subr.bf16.mxu1 %v1528_v55  ;;  %v552_v29 = vsub.s32 1, %v547_v26  ;;  %v1557_v55 = vld [vmem:[#allocation17 + $0x18] sm:$0xff]  }
  0xc2   :  { %1376 = vmatpush3.bf16.msra.mxu0 %v1504_v27  ;;  %v548_v27 = vsub.s32 0, %v547_v26  ;;  %v553_v31 = vrot.slane %v544_v28, %v552_v29 }
  0xc3   :  { %1381 = vmatprep.subr.bf16.mxu0 %v1857_v0  ;;  %651 = vmatpush1.bf16.msra.mxu1 %v1526_v56  ;;  %v1558_v56 = vld [vmem:[#allocation17 + $0x10] sm:$0xff]  }
  0xc4   :  { %1401 = vmatprep.subr.bf16.mxu1 %v1857_v0  ;;  %v549_v30 = vrot.slane %v544_v28, %v548_v27 }
 0x165   :  { %v311_v42 = vpop.f32.mrf.mxu0  ;;  %v399_v43 = vpop.f32.mrf.mxu1 }
 0x166   :  { %v400_v45 = vadd.f32 %v399_v43, %v311_v42 }
 0x167   :  { %v1339_v46 = vpop.f32.mrf.mxu0  ;;  %v1359_v47 = vpop.f32.mrf.mxu1 }
 0x168   :  { %v412_v48 = vadd.f32 %v1197_v44, %v400_v45 }
 0x169   :  { %v314_v49 = vpop.f32.mrf.mxu0  ;;  %v402_v50 = vpop.f32.mrf.mxu1 }
 0x16a   :  { %v413_v51 = vmax.f32 %v412_v48, 0.0  ;;  %v1551_v49 = vld [vmem:[#allocation16 + $0x8] sm:$0xff]   ;;  %v1552_v50 = vld [vmem:[#allocation16] sm:$0xff]  }
 0x16b   :  { %v1340_v52 = vpop.f32.mrf.mxu0  ;;  %v1360_v53 = vpop.f32.mrf.mxu1 }
 0x16c   :  { %v414_v54 = vpack.c.bf16 %v413_v51, %v413_v51  ;;  %v1553_v51 = vld [vmem:[#allocation17 + $0x38] sm:$0xff]   ;;  %v1554_v52 = vld [vmem:[#allocation17 + $0x30] sm:$0xff]   ;;  %v1555_v53 = vld [vmem:[#allocation17 + $0x28] sm:$0xff]  }
 0x16e   :  { %1378 = vmatmul.mubr.bf16.vlgmr.msra.gmra.mxu0 %v414_v54  ;;  %v1556_v54 = vld [vmem:[#allocation17 + $0x20] sm:$0xff]  }
 0x16f   :  { %1397 = vmatprep.mubr.msk.bf16.mxu0 %vm1858_vm0, %v1857_v0  ;;  %1382 = vmatpush3.bf16.msra.mxu0 %v1529_v58  ;;  %v1239_v58 = vld [vmem:[%s2130_s12] ss:$0 sm:$0xff]  ;;  %s1860_s12 = smov [#allocation20]  }
 0x170   :  { %1383 = vmatprep.subr.bf16.mxu0 %v1857_v0  ;;  %s1150_s0 = sshll.u32 %s1860_s12, 4  ;;  %s1151_s0 = int_to_ptr.vmem [resolvable:$true] %s1150_s0 }
 0x171   :  { %s1767_s30 = scalar_lea.vmem %s1151_s0, 32  ;;  %p1772_p9 = scmp.lt.s32.totalorder %s1151_s0, %s1151_s0 }
 0x172   :  { %p1768_p8 = scmp.ne.s32.totalorder %s1151_s0, %s1767_s30  ;;  %p1773_p10 = scmp.lt.s32.totalorder %s1767_s30, %s1767_s30 }
 0x173   :  { %1384 = vmatpush3.bf16.msra.mxu0 %v1530_v59 }
 0x174   :  { %1385 = vmatprep.subr.bf16.mxu0 %v1857_v0  ;;  %p1774_p11 = por %p1773_p10, %p1772_p9 }
 0x176   :  { %p1775_p12 = pnand %p1774_p11, %p1768_p8 }
 0x177   :  { %1386 = vmatpush3.bf16.msra.mxu0 %v1532_v6 }
 0x178   :  { %1387 = vmatprep.subr.bf16.mxu0 %v1857_v0 }
 0x17b   :  { %1388 = vmatpush3.bf16.msra.mxu0 %v1534_v8 }
 0x17c   :  { %1389 = vmatprep.subr.bf16.mxu0 %v1857_v0 }
 0x17f   :  { %1390 = vmatpush3.bf16.msra.mxu0 %v1536_v10 }
 0x180   :  { %1391 = vmatprep.subr.bf16.mxu0 %v1857_v0 }
 0x183   :  { %1392 = vmatpush3.bf16.msra.mxu0 %v1538_v12 }
 0x184   :  { %1393 = vmatprep.subr.bf16.mxu0 %v1857_v0 }
 0x187   :  { %1394 = vmatpush3.bf16.msra.mxu0 %v1540_v14 }
 0x188   :  { %1395 = vmatprep.subr.bf16.mxu0 %v1857_v0 }
 0x18b   :  { %1396 = vmatpush3.bf16.msra.mxu0 %v1542_v16 }
 0x18c   :  { %1421 = vmatprep.subr.bf16.mxu0 %v1857_v0 }
 0x18e   :  { %1398 = vmatmul.mubr.bf16.vlgmr.msra.gmra.mxu0 %v2034_v19  ;;  %v1549_v19 = vld [vmem:[#allocation16 + $0x18] sm:$0xff]  }
 0x18f   :  { %1437 = vmatprep.mubr.msk.bf16.mxu0 %vm1858_vm0, %v1857_v0  ;;  %1422 = vmatpush3.bf16.msra.mxu0 %v1545_v20 }
 0x190   :  { %1423 = vmatprep.subr.bf16.mxu0 %v1857_v0 }
 0x193   :  { %1424 = vmatpush3.bf16.msra.mxu0 %v1546_v21 }
 0x194   :  { %1425 = vmatprep.subr.bf16.mxu0 %v1857_v0 }
 0x197   :  { %1426 = vmatpush3.bf16.msra.mxu0 %v1547_v22 }
 0x198   :  { %1427 = vmatprep.subr.bf16.mxu0 %v1857_v0 }
 0x19b   :  { %1428 = vmatpush3.bf16.msra.mxu0 %v1548_v23 }
 0x19c   :  { %1429 = vmatprep.subr.bf16.mxu0 %v1857_v0 }
 0x19f   :  { %1430 = vmatpush3.bf16.msra.mxu0 %v1549_v19 }
 0x1a0   :  { %1431 = vmatprep.subr.bf16.mxu0 %v1857_v0 }
 0x1a3   :  { %1432 = vmatpush3.bf16.msra.mxu0 %v1550_v24 }
 0x1a4   :  { %1433 = vmatprep.subr.bf16.mxu0 %v1857_v0 }
 0x1a7   :  { %1434 = vmatpush3.bf16.msra.mxu0 %v1551_v49 }
 0x1a8   :  { %1435 = vmatprep.subr.bf16.mxu0 %v1857_v0 }
 0x1ab   :  { %1436 = vmatpush3.bf16.msra.mxu0 %v1552_v50 }
 0x22e   :  { %v520_v61 = vpop.f32.mrf.mxu0 }
 0x22f   :  { %v521_v62 = vadd.f32 %v1198_v60, %v520_v61 }
 0x230   :  { %v1379_v63 = vpop.f32.mrf.mxu0 }
 0x231   :  { %v526_v1 = vmax.f32 %v521_v62, 0.0 }
 0x232   :  { %v523_v2 = vpop.f32.mrf.mxu0 }
 0x233   :  { %v527_v4 = vpack.c.bf16 %v526_v1, %v526_v1 }
 0x234   :  { %v1380_v5 = vpop.f32.mrf.mxu0 }
 0x235   :  { %669 = vmatmul.mubr.bf16.vlgmr.msra.gmra.mxu1 %v527_v4  ;;  %v1560_v4 = vld [vmem:[#allocation17] sm:$0xff]   ;;  %v1240_v5 = vld [vmem:[%s2132_s14] ss:$0 sm:$0xff] }
 0x236   :  { %1402 = vmatpush3.bf16.msra.mxu1 %v1531_v3  ;;  %1417 = vmatprep.mubr.msk.bf16.mxu1 %vm1858_vm0, %v1857_v0  ;;  %v1559_v3 = vld [vmem:[#allocation17 + $0x8] sm:$0xff]  }
 0x237   :  { %1403 = vmatprep.subr.bf16.mxu1 %v1857_v0 }
 0x23a   :  { %1404 = vmatpush3.bf16.msra.mxu1 %v1533_v7 }
 0x23b   :  { %1405 = vmatprep.subr.bf16.mxu1 %v1857_v0 }
 0x23e   :  { %1406 = vmatpush3.bf16.msra.mxu1 %v1535_v9 }
 0x23f   :  { %1407 = vmatprep.subr.bf16.mxu1 %v1857_v0 }
 0x242   :  { %1408 = vmatpush3.bf16.msra.mxu1 %v1537_v11 }
 0x243   :  { %1409 = vmatprep.subr.bf16.mxu1 %v1857_v0 }
 0x246   :  { %1410 = vmatpush3.bf16.msra.mxu1 %v1539_v13 }
 0x247   :  { %1411 = vmatprep.subr.bf16.mxu1 %v1857_v0 }
 0x24a   :  { %1412 = vmatpush3.bf16.msra.mxu1 %v1541_v15 }
 0x24b   :  { %1413 = vmatprep.subr.bf16.mxu1 %v1857_v0 }
 0x24e   :  { %1414 = vmatpush3.bf16.msra.mxu1 %v1543_v17  ;;  %v800_v45 = vpop.f32.mrf.mxu0 }
 0x24f   :  { %1415 = vmatprep.subr.bf16.mxu1 %v1857_v0 }
 0x250   :  { %v1399_v46 = vpop.f32.mrf.mxu0 }
 0x252   :  { %1416 = vmatpush3.bf16.msra.mxu1 %v1544_v18  ;;  %v803_v47 = vpop.f32.mrf.mxu0 }
 0x253   :  { %1441 = vmatprep.subr.bf16.mxu1 %v1857_v0 }
 0x254   :  { %v1400_v48 = vpop.f32.mrf.mxu0 }
 0x2f5   :  { %v670_v32 = vpop.f32.mrf.mxu1 }
 0x2f6   :  { %v671_v33 = vadd.f32 %v670_v32, %v549_v30 }
 0x2f7   :  { %v672_v34 = vpop.f32.mrf.mxu1 }
 0x2f8   :  { %677 = vst [vmem:[#allocation20] sm:$0x3] %v671_v33  ;;  %v673_v35 = vadd.f32 %v672_v34, %v553_v31 }
 0x2f9   :  { %v674_v36 = vpop.f32.mrf.mxu1 }
 0x2fa   :  { %678 = vst [vmem:[#allocation22] sm:$0x3] %v673_v35  ;;  %v680_v37 = vmul.f32 0.5, %v673_v35 }
 0x2fb   :  { %v675_v38 = vpop.f32.mrf.mxu1 }
 0x2fc   :  { %v681_v39 = vmul.f32 1.442695, %v680_v37 }
 0x2fe   :  { %1561 = vpow2.f32 %v681_v39 }
 0x30b   :  { %v1562_v41 = vpop.eup %1561 }
 0x30c   :  { %v683_v42 = vmul.f32 %v1562_v41, %v679_v40 }
 0x30e   :  { %v684_v43 = vadd.f32 %v683_v42, %v671_v33 }
 0x310   :  { %v685_v44 = vpack.c.bf16 %v684_v43, %v684_v43 }
 0x312   :  { %1418 = vmatmul.mubr.bf16.vlgmr.msra.gmra.mxu1 %v685_v44 }
 0x313   :  { %1457 = vmatprep.mubr.msk.bf16.mxu1 %vm1858_vm0, %v1857_v0  ;;  %1442 = vmatpush3.bf16.msra.mxu1 %v1553_v51 }
 0x314   :  { %1443 = vmatprep.subr.bf16.mxu1 %v1857_v0 }
 0x317   :  { %1444 = vmatpush3.bf16.msra.mxu1 %v1554_v52 }
 0x318   :  { %1445 = vmatprep.subr.bf16.mxu1 %v1857_v0 }
 0x31b   :  { %1446 = vmatpush3.bf16.msra.mxu1 %v1555_v53 }
 0x31c   :  { %1447 = vmatprep.subr.bf16.mxu1 %v1857_v0 }
 0x31f   :  { %1448 = vmatpush3.bf16.msra.mxu1 %v1556_v54 }
 0x320   :  { %1449 = vmatprep.subr.bf16.mxu1 %v1857_v0 }
 0x323   :  { %1450 = vmatpush3.bf16.msra.mxu1 %v1557_v55 }
 0x324   :  { %1451 = vmatprep.subr.bf16.mxu1 %v1857_v0 }
 0x327   :  { %1452 = vmatpush3.bf16.msra.mxu1 %v1558_v56 }
 0x328   :  { %1453 = vmatprep.subr.bf16.mxu1 %v1857_v0 }
 0x32b   :  { %1454 = vmatpush3.bf16.msra.mxu1 %v1559_v3 }
 0x32c   :  { %1455 = vmatprep.subr.bf16.mxu1 %v1857_v0 }
 0x32f   :  { %1456 = vmatpush3.bf16.msra.mxu1 %v1560_v4 }
 0x3d2   :  { %v888_v57 = vpop.f32.mrf.mxu1 }
 0x3d3   :  { %v889_v59 = vadd.f32 %v888_v57, %v800_v45 }
 0x3d4   :  { %v1419_v60 = vpop.f32.mrf.mxu1 }
 0x3d5   :  { %v901_v61 = vadd.f32 %v1239_v58, %v889_v59 }
 0x3d6   :  { %v891_v62 = vpop.f32.mrf.mxu1 }
 0x3d7   :  { %v902_v63 = vmax.f32 %v901_v61, 0.0 }
 0x3d8   :  { %v1420_v1 = vpop.f32.mrf.mxu1 }
 0x3d9   :  { %v903_v2 = vpack.c.bf16 %v902_v63, %v902_v63 }
 0x3db   :  { %1438 = vmatmul.mubr.bf16.vlgmr.msra.gmra.mxu0 %v903_v2 }
 0x49b   :  { %v1009_v6 = vpop.f32.mrf.mxu0 }
 0x49c   :  { %v1010_v7 = vadd.f32 %v1240_v5, %v1009_v6 }
 0x49d   :  { %v1439_v8 = vpop.f32.mrf.mxu0 }
 0x49e   :  { %v1015_v9 = vmax.f32 %v1010_v7, 0.0 }
 0x49f   :  { %v1012_v10 = vpop.f32.mrf.mxu0 }
 0x4a0   :  { %v1016_v11 = vpack.c.bf16 %v1015_v9, %v1015_v9 }
 0x4a1   :  { %v1440_v12 = vpop.f32.mrf.mxu0 }
 0x4a2   :  { %1458 = vmatmul.mubr.bf16.vlgmr.msra.gmra.mxu1 %v1016_v11 }
 0x4a3   :  { %1778 = shalt.err (!%p1775_p12)
}
 0x4a4   :  { %1153 = dma.vmem_to_hbm [thread:$0]  %s1151_s0, 32, %s2136_s18, [#allocation21]  }
 0x4a5   :  { %s1861_s21 = smov [#allocation22]  }
 0x4a6   :  { %s1160_s6 = sshll.u32 %s1861_s21, 4  ;;  %s1161_s6 = int_to_ptr.vmem [resolvable:$true] %s1160_s6 }
 0x4a7   :  { %s1787_s1 = scalar_lea.vmem %s1161_s6, 32  ;;  %p1792_p0 = scmp.lt.s32.totalorder %s1161_s6, %s1161_s6 }
 0x4a8   :  { %p1788_p13 = scmp.ne.s32.totalorder %s1161_s6, %s1787_s1  ;;  %p1793_p1 = scmp.lt.s32.totalorder %s1787_s1, %s1787_s1 }
 0x4aa   :  { %p1794_p2 = por %p1793_p1, %p1792_p0 }
 0x4ac   :  { %p1795_p3 = pnand %p1794_p2, %p1788_p13 }
 0x4ae   :  { %1798 = shalt.err (!%p1795_p3)
}
 0x4af   :  { %1163 = dma.vmem_to_hbm [thread:$0]  %s1161_s6, 32, %s2137_s19, [#allocation21]   ;;  %v1249_v0 = vld [vmem:[%s2134_s16] ss:$0 sm:$0xff] }
 0x4b0   :  { %s1862_s18 = smov [#allocation19]  }
 0x4b1   :  { %s1140_s10 = sshll.u32 %s1862_s18, 4  ;;  %s1141_s10 = int_to_ptr.vmem [resolvable:$true] %s1140_s10 }
 0x4b2   :  { %s1807_s19 = scalar_lea.vmem %s1141_s10, 32  ;;  %p1812_p5 = scmp.lt.s32.totalorder %s1141_s10, %s1141_s10 }
 0x4b3   :  { %p1808_p4 = scmp.ne.s32.totalorder %s1141_s10, %s1807_s19  ;;  %p1813_p6 = scmp.lt.s32.totalorder %s1807_s19, %s1807_s19 }
 0x4b5   :  { %p1814_p7 = por %p1813_p6, %p1812_p5 }
 0x4b7   :  { %p1815_p8 = pnand %p1814_p7, %p1808_p4 }
 0x562   :  { %v1122_v13 = vpop.f32.mrf.mxu1 }
 0x563   :  { %v1123_v14 = vadd.f32 %v1249_v0, %v1122_v13 }
 0x564   :  { %v1459_v15 = vpop.f32.mrf.mxu1 }
 0x565   :  { %v1128_v16 = vsub.f32 0.0, %v1123_v14 }
 0x566   :  { %v1125_v17 = vpop.f32.mrf.mxu1 }
 0x567   :  { %v1129_v18 = vmul.f32 1.442695, %v1128_v16 }
 0x568   :  { %v1460_v20 = vpop.f32.mrf.mxu1 }
 0x569   :  { %1563 = vpow2.f32 %v1129_v18 }
 0x576   :  { %v1564_v21 = vpop.eup %1563 }
 0x577   :  { %v1131_v22 = vadd.f32 1.0, %v1564_v21 }
 0x579   :  { %1565 = vrcp.f32 %v1131_v22 }
 0x586   :  { %v1566_v23 = vpop.eup %1565 }
 0x587   :  { %1133 = vst [vmem:[#allocation19] sm:$0x3] %v1566_v23 }
 0x588   :  { %1818 = shalt.err (!%p1815_p8)
}
 0x589   :  { %1143 = dma.vmem_to_hbm [thread:$0]  %s1141_s10, 32, %s2135_s17, [#allocation4]  }
 0x58a   :  { %1839 = dma.done.wait [#allocation4], 32  }
 0x58b   :  { %1840 = vsyncadd [#allocation4], 4294967264 }
 0x58c   :  { %1841 = dma.done.wait [#allocation21], 64  }
 0x58d   :  { %1842 = vsyncadd [#allocation21], 4294967232 }
 0x58e   :  { %1173 = vsyncpa [#allocation3], 1 }
 0x58f   :  { %1174 = vsyncpa [#allocation6], 1 }
 0x590   :  { %1175 = vsyncpa [#allocation9], 1 }
 0x591   :  { %1176 = vsyncpa [#allocation12], 1 }
 0x592   :  { %1177 = vsyncpa [#allocation15], 1 }
 0x593   :  { %1178 = vsyncpa [#allocation18], 1 }
 0x594   :  { %1179 = vsyncpa [#allocation4], 1 }
 0x595   :  { %1180 = vsyncpa [#allocation21], 1 }

// kernel: tpu_custom_call.1
= control target key start
LH: loop header
LB: loop body
LE: loop exit
PB: predicated region body
PF: predicated region fallthrough
CT: control target
= control target key end

     0   :  { %s2118_s0 = inlined_call_operand.hbm [shape: bf16[2,128], index: 0, kind: input, shape index: {}]   ;;  %s2119_s1 = inlined_call_operand.hbm [shape: f32[2,128], index: 1, kind: input, shape index: {}]   ;;  %s2120_s2 = inlined_call_operand.vmem [shape: f32[2,128], index: 2, kind: input, shape index: {}]   ;;  %s2121_s3 = inlined_call_operand.hbm [shape: bf16[128,128], index: 3, kind: input, shape index: {}]   ;;  %s2122_s4 = inlined_call_operand.hbm [shape: bf16[128,128], index: 4, kind: input, shape index: {}]   ;;  %s2123_s5 = inlined_call_operand.vmem [shape: f32[1,128], index: 5, kind: input, shape index: {}]   ;;  %s2124_s6 = inlined_call_operand.hbm [shape: bf16[128,128], index: 6, kind: input, shape index: {}]   ;;  %s2125_s7 = inlined_call_operand.vmem [shape: f32[1,128], index: 7, kind: input, shape index: {}]   ;;  %s2126_s8 = inlined_call_operand.hbm [shape: bf16[128,256], index: 8, kind: input, shape index: {}]   ;;  %s2127_s9 = inlined_call_operand.vmem [shape: f32[1,256], index: 9, kind: input, shape index: {}]   ;;  %s2128_s10 = inlined_call_operand.hbm [shape: bf16[128,128], index: 10, kind: input, shape index: {}]   ;;  %s2129_s11 = inlined_call_operand.hbm [shape: bf16[128,128], index: 11, kind: input, shape index: {}]   ;;  %s2130_s12 = inlined_call_operand.vmem [shape: f32[1,128], index: 12, kind: input, shape index: {}]   ;;  %s2131_s13 = inlined_call_operand.hbm [shape: bf16[128,128], index: 13, kind: input, shape index: {}]   ;;  %s2132_s14 = inlined_call_operand.vmem [shape: f32[1,128], index: 14, kind: input, shape index: {}]   ;;  %s2133_s15 = inlined_call_operand.hbm [shape: bf16[128,128], index: 15, kind: input, shape index: {}]   ;;  %s2134_s16 = inlined_call_operand.vmem [shape: f32[1,128], index: 16, kind: input, shape index: {}]   ;;  %s2135_s17 = inlined_call_operand.hbm [shape: f32[2,128], index: 17, kind: output, shape index: {0}]   ;;  %s2136_s18 = inlined_call_operand.hbm [shape: f32[2,128], index: 18, kind: output, shape index: {1}]   ;;  %s2137_s19 = inlined_call_operand.hbm [shape: f32[2,128], index: 19, kind: output, shape index: {2}]  }
   0x1   :  { %2138 = sst [smem:[#allocation31_spill]] %s2118_s0 }
   0x2   :  { %2139 = sst [smem:[#allocation32_spill]] %s2119_s1 }
   0x3   :  { %2140 = sst [smem:[#allocation33_spill]] %s2120_s2 }
   0x4   :  { %2141 = sst [smem:[#allocation34_spill]] %s2121_s3 }
   0x5   :  { %25 = vsyncpa [#allocation3], 0 }
   0x6   :  { %26 = vsyncpa [#allocation6], 0 }
   0x7   :  { %27 = vsyncpa [#allocation9], 0 }
   0x8   :  { %28 = vsyncpa [#allocation12], 0 }
   0x9   :  { %29 = vsyncpa [#allocation15], 0 }
   0xa   :  { %30 = vsyncpa [#allocation18], 0 }
   0xb   :  { %31 = vsyncpa [#allocation4], 0 }
   0xc   :  { %32 = vsyncpa [#allocation21], 0  ;;  %s1843_s0 = smov [#allocation5]  }
   0xd   :  { %s49_s30 = sshll.u32 %s1843_s0, 4  ;;  %s50_s30 = int_to_ptr.vmem [resolvable:$true] %s49_s30 }
   0xe   :  { %s1575_s20 = scalar_lea.vmem %s50_s30, 32  ;;  %p1580_p1 = scmp.lt.s32.totalorder %s50_s30, %s50_s30 }
   0xf   :  { %p1576_p0 = scmp.ne.s32.totalorder %s50_s30, %s1575_s20  ;;  %p1581_p2 = scmp.lt.s32.totalorder %s1575_s20, %s1575_s20 }
  0x11   :  { %p1582_p3 = por %p1581_p2, %p1580_p1 }
  0x13   :  { %p1583_p4 = pnand %p1582_p3, %p1576_p0 }
  0x15   :  { %1586 = shalt.err (!%p1583_p4)
}
  0x16   :  { %s2142_s22 = sld [smem:[#allocation32_spill]]  ;;  %s1844_s2 = smov [#allocation8]  }
  0x17   :  { %s72_s23 = sshll.u32 %s1844_s2, 4  ;;  %s1845_s24 = smov [#allocation11]   ;;  %s73_s23 = int_to_ptr.vmem [resolvable:$true] %s72_s23 }
  0x18   :  { %s100_s25 = sshll.u32 %s1845_s24, 4  ;;  %s1595_s3 = scalar_lea.vmem %s73_s23, 1024  ;;  %s101_s25 = int_to_ptr.vmem [resolvable:$true] %s100_s25 }
  0x19   :  { %p1596_p5 = scmp.ne.s32.totalorder %s73_s23, %s1595_s3  ;;  %p1600_p6 = scmp.lt.s32.totalorder %s73_s23, %s73_s23 }
  0x1a   :  { %p1601_p7 = scmp.lt.s32.totalorder %s1595_s3, %s1595_s3 }
  0x1c   :  { %52 = dma.hbm_to_vmem [thread:$0]  %s2142_s22, 32, %s50_s30, [#allocation6]  }
  0x1d   :  { %p1602_p8 = por %p1601_p7, %p1600_p6 }
  0x1f   :  { %p1603_p9 = pnand %p1602_p8, %p1596_p5 }
  0x21   :  { %1606 = shalt.err (!%p1603_p9)
}
  0x22   :  { %s1846_s26 = smov 64   ;;  %s1847_s27 = smov 4  }
  0x23   :  { %78 = dma.hbm_to_vmem [thread:$0]  %s2122_s4, 1024, %s73_s23, [#allocation9], %s1846_s26, %s1846_s26, %s1847_s27  }
  0x24   :  { %s1615_s0 = scalar_lea.vmem %s101_s25, 2048  ;;  %p1620_p11 = scmp.lt.s32.totalorder %s101_s25, %s101_s25 }
  0x25   :  { %p1616_p10 = scmp.ne.s32.totalorder %s101_s25, %s1615_s0  ;;  %p1621_p12 = scmp.lt.s32.totalorder %s1615_s0, %s1615_s0 }
  0x27   :  { %p1622_p13 = por %p1621_p12, %p1620_p11 }
  0x29   :  { %p1623_p0 = pnand %p1622_p13, %p1616_p10 }
  0x2b   :  { %1626 = shalt.err (!%p1623_p0)
}
  0x2c   :  { %s1848_s30 = smov 128   ;;  %s1849_s20 = smov 8  }
  0x2d   :  { %106 = dma.hbm_to_vmem [thread:$0]  %s2126_s8, 2048, %s101_s25, [#allocation12], %s1848_s30, %s1848_s30, %s1849_s20  }
  0x2e   :  { %s1850_s22 = smov [#allocation14]   ;;  %s1851_s24 = smov [#allocation2]  }
  0x2f   :  { %s126_s2 = sshll.u32 %s1850_s22, 4  ;;  %s39_s3 = sshll.u32 %s1851_s24, 4  ;;  %s127_s2 = int_to_ptr.vmem [resolvable:$true] %s126_s2  ;;  %s40_s3 = int_to_ptr.vmem [resolvable:$true] %s39_s3 }
  0x30   :  { %s1635_s4 = scalar_lea.vmem %s127_s2, 1024  ;;  %p1640_p2 = scmp.lt.s32.totalorder %s127_s2, %s127_s2 }
  0x31   :  { %p1636_p1 = scmp.ne.s32.totalorder %s127_s2, %s1635_s4  ;;  %p1641_p3 = scmp.lt.s32.totalorder %s1635_s4, %s1635_s4 }
  0x33   :  { %p1642_p4 = por %p1641_p3, %p1640_p2 }
  0x35   :  { %p1643_p5 = pnand %p1642_p4, %p1636_p1 }
  0x37   :  { %1646 = shalt.err (!%p1643_p5)
}
  0x38   :  { %132 = dma.hbm_to_vmem [thread:$0]  %s2129_s11, 1024, %s127_s2, [#allocation15], %s1846_s26, %s1846_s26, %s1847_s27  }
  0x39   :  { %s1655_s8 = scalar_lea.vmem %s40_s3, 16  ;;  %s1659_s25 = scalar_lea.vmem %s40_s3, 32 }
  0x3a   :  { %p1656_p6 = scmp.ne.s32.totalorder %s40_s3, %s1655_s8  ;;  %p1660_p7 = scmp.lt.s32.totalorder %s40_s3, %s40_s3 }
  0x3b   :  { %p1661_p8 = scmp.lt.s32.totalorder %s1659_s25, %s1655_s8 }
  0x3d   :  { %p1662_p9 = por %p1661_p8, %p1660_p7 }
  0x3f   :  { %p1663_p10 = pnand %p1662_p9, %p1656_p6 }
  0x41   :  { %1666 = shalt.err (!%p1663_p10)
}
  0x42   :  { %s2143_s30 = sld [smem:[#allocation31_spill]]  ;;  %s1852_s20 = smov [#allocation7]  }
  0x43   :  { %s60_s21 = sshll.u32 %s1852_s20, 4  ;;  %s1853_s1 = smov [#allocation10]   ;;  %s61_s21 = int_to_ptr.vmem [resolvable:$true] %s60_s21 }
  0x44   :  { %s86_s22 = sshll.u32 %s1853_s1, 4  ;;  %s1675_s24 = scalar_lea.vmem %s61_s21, 1024  ;;  %s87_s22 = int_to_ptr.vmem [resolvable:$true] %s86_s22 }
  0x45   :  { %p1676_p11 = scmp.ne.s32.totalorder %s61_s21, %s1675_s24  ;;  %p1680_p12 = scmp.lt.s32.totalorder %s61_s21, %s61_s21 }
  0x46   :  { %p1681_p13 = scmp.lt.s32.totalorder %s1675_s24, %s1675_s24 }
  0x48   :  { %42 = dma.hbm_to_vmem [thread:$0]  %s2143_s30, 16, %s40_s3, [#allocation3]  }
  0x49   :  { %p1682_p0 = por %p1681_p13, %p1680_p12 }
  0x4b   :  { %p1683_p1 = pnand %p1682_p0, %p1676_p11 }
  0x4d   :  { %1686 = shalt.err (!%p1683_p1)
}
  0x4e   :  { %s2144_s4 = sld [smem:[#allocation34_spill]]  ;;  %s1695_s3 = scalar_lea.vmem %s87_s22, 1024 }
  0x4f   :  { %p1696_p2 = scmp.ne.s32.totalorder %s87_s22, %s1695_s3  ;;  %p1700_p3 = scmp.lt.s32.totalorder %s87_s22, %s87_s22 }
  0x50   :  { %p1701_p4 = scmp.lt.s32.totalorder %s1695_s3, %s1695_s3 }
  0x52   :  { %p1702_p5 = por %p1701_p4, %p1700_p3 }
  0x54   :  { %66 = dma.hbm_to_vmem [thread:$0]  %s2144_s4, 1024, %s61_s21, [#allocation6], %s1846_s26, %s1846_s26, %s1847_s27  }
  0x55   :  { %p1703_p6 = pnand %p1702_p5, %p1696_p2 }
  0x57   :  { %1706 = shalt.err (!%p1703_p6)
}
  0x58   :  { %92 = dma.hbm_to_vmem [thread:$0]  %s2124_s6, 1024, %s87_s22, [#allocation9], %s1846_s26, %s1846_s26, %s1847_s27  }
  0x59   :  { %s1854_s8 = smov [#allocation13]   ;;  %s1855_s29 = smov [#allocation16]  }
  0x5a   :  { %s114_s25 = sshll.u32 %s1854_s8, 4  ;;  %s140_s0 = sshll.u32 %s1855_s29, 4  ;;  %s115_s25 = int_to_ptr.vmem [resolvable:$true] %s114_s25  ;;  %s141_s0 = int_to_ptr.vmem [resolvable:$true] %s140_s0 }
  0x5b   :  { %s1715_s30 = scalar_lea.vmem %s115_s25, 1024  ;;  %p1720_p8 = scmp.lt.s32.totalorder %s115_s25, %s115_s25 }
  0x5c   :  { %p1716_p7 = scmp.ne.s32.totalorder %s115_s25, %s1715_s30  ;;  %p1721_p9 = scmp.lt.s32.totalorder %s1715_s30, %s1715_s30 }
  0x5e   :  { %p1722_p10 = por %p1721_p9, %p1720_p8 }
  0x60   :  { %p1723_p11 = pnand %p1722_p10, %p1716_p7 }
  0x62   :  { %1726 = shalt.err (!%p1723_p11)
}
  0x63   :  { %120 = dma.hbm_to_vmem [thread:$0]  %s2128_s10, 1024, %s115_s25, [#allocation12], %s1846_s26, %s1846_s26, %s1847_s27  }
  0x64   :  { %s1735_s6 = scalar_lea.vmem %s141_s0, 1024  ;;  %p1740_p13 = scmp.lt.s32.totalorder %s141_s0, %s141_s0 }
  0x65   :  { %p1736_p12 = scmp.ne.s32.totalorder %s141_s0, %s1735_s6  ;;  %p1741_p0 = scmp.lt.s32.totalorder %s1735_s6, %s1735_s6 }
  0x67   :  { %p1742_p1 = por %p1741_p0, %p1740_p13 }
  0x69   :  { %p1743_p2 = pnand %p1742_p1, %p1736_p12 }
  0x6b   :  { %1746 = shalt.err (!%p1743_p2)
}
  0x6c   :  { %146 = dma.hbm_to_vmem [thread:$0]  %s2131_s13, 1024, %s141_s0, [#allocation15], %s1846_s26, %s1846_s26, %s1847_s27  }
  0x6d   :  { %s1856_s24 = smov [#allocation17]  }
  0x6e   :  { %s154_s11 = sshll.u32 %s1856_s24, 4  ;;  %s155_s11 = int_to_ptr.vmem [resolvable:$true] %s154_s11 }
  0x6f   :  { %s1755_s2 = scalar_lea.vmem %s155_s11, 1024  ;;  %p1760_p4 = scmp.lt.s32.totalorder %s155_s11, %s155_s11 }
  0x70   :  { %p1756_p3 = scmp.ne.s32.totalorder %s155_s11, %s1755_s2  ;;  %p1761_p5 = scmp.lt.s32.totalorder %s1755_s2, %s1755_s2 }
  0x72   :  { %p1762_p6 = por %p1761_p5, %p1760_p4 }
  0x74   :  { %p1763_p7 = pnand %p1762_p6, %p1756_p3 }
  0x76   :  { %1766 = shalt.err (!%p1763_p7)
}
  0x77   :  { %160 = dma.hbm_to_vmem [thread:$0]  %s2133_s15, 1024, %s155_s11, [#allocation18], %s1846_s26, %s1846_s26, %s1847_s27  }
  0x78   :  { %1827 = dma.done.wait [#allocation3], 16  }
  0x79   :  { %1828 = vsyncadd [#allocation3], 4294967280 }
  0x7a   :  { %1829 = dma.done.wait [#allocation6], 1056  }
  0x7b   :  { %1830 = vsyncadd [#allocation6], 4294966240 }
  0x7c   :  { %1831 = dma.done.wait [#allocation9], 2048  }
  0x7d   :  { %1832 = vsyncadd [#allocation9], 4294965248 }
  0x7e   :  { %1833 = dma.done.wait [#allocation12], 3072  }
  0x7f   :  { %1834 = vsyncadd [#allocation12], 4294964224 }
  0x80   :  { %1835 = dma.done.wait [#allocation15], 2048  }
  0x81   :  { %1836 = vsyncadd [#allocation15], 4294965248 }
  0x82   :  { %1837 = dma.done.wait [#allocation18], 1024  }
  0x83   :  { %1838 = vsyncadd [#allocation18], 4294966272  ;;  %v1857_v0 = vmov 0.0   ;;  %vm1858_vm0 = vmmov 0   ;;  %v1481_v1 = vld [vmem:[#allocation8 + $0x38] sm:$0xff]   ;;  %v1483_v3 = vld [vmem:[#allocation8 + $0x30] sm:$0xff]  }
  0x84   :  { %1321 = vmatprep.subr.bf16.mxu0 %v1857_v0  ;;  %1341 = vmatprep.subr.bf16.mxu1 %v1857_v0  ;;  %v1482_v2 = vld [vmem:[#allocation7 + $0x38] sm:$0xff]   ;;  %v1484_v4 = vld [vmem:[#allocation7 + $0x30] sm:$0xff]   ;;  %v1485_v5 = vld [vmem:[#allocation8 + $0x28] sm:$0xff]   ;;  %v1859_v57 = vmov 0   ;;  %s2145_s28 = sld [smem:[#allocation33_spill]] }
  0x85   :  { %1337 = vmatprep.mubr.msk.bf16.mxu0 %vm1858_vm0, %v1857_v0  ;;  %1357 = vmatprep.mubr.msk.bf16.mxu1 %vm1858_vm0, %v1857_v0  ;;  %v1486_v6 = vld [vmem:[#allocation7 + $0x28] sm:$0xff]   ;;  %v1487_v7 = vld [vmem:[#allocation8 + $0x20] sm:$0xff]   ;;  %v1489_v9 = vld [vmem:[#allocation8 + $0x18] sm:$0xff]  }
  0x86   :  { %1322 = vmatpush3.bf16.msra.mxu0 %v1481_v1  ;;  %1342 = vmatpush3.bf16.msra.mxu1 %v1482_v2  ;;  %v1488_v8 = vld [vmem:[#allocation7 + $0x20] sm:$0xff]   ;;  %v1490_v10 = vld [vmem:[#allocation7 + $0x18] sm:$0xff]   ;;  %v1491_v11 = vld [vmem:[#allocation8 + $0x10] sm:$0xff]  }
  0x87   :  { %1323 = vmatprep.subr.bf16.mxu0 %v1857_v0  ;;  %1343 = vmatprep.subr.bf16.mxu1 %v1857_v0  ;;  %v1492_v12 = vld [vmem:[#allocation7 + $0x10] sm:$0xff]   ;;  %v1493_v13 = vld [vmem:[#allocation8 + $0x8] sm:$0xff]   ;;  %v1495_v15 = vld [vmem:[#allocation8] sm:$0xff]  }
  0x88   :  { %v1494_v14 = vld [vmem:[#allocation7 + $0x8] sm:$0xff]   ;;  %v195_v16 = vld [vmem:[#allocation5] sm:$0x3]  ;;  %v1496_v17 = vld [vmem:[#allocation7] sm:$0xff]  }
  0x89   :  { %v1497_v18 = vld [vmem:[#allocation10 + $0x38] sm:$0xff]   ;;  %v2034_v19 = vpack.c.bf16 %v195_v16, %v195_v16  ;;  %v1498_v21 = vld [vmem:[#allocation10 + $0x30] sm:$0xff]   ;;  %v1499_v22 = vld [vmem:[#allocation10 + $0x28] sm:$0xff]  }
  0x8a   :  { %1324 = vmatpush3.bf16.msra.mxu0 %v1483_v3  ;;  %1344 = vmatpush3.bf16.msra.mxu1 %v1484_v4  ;;  %v194_v20 = vld [vmem:[#allocation2] sm:$0x1]  ;;  %v1500_v23 = vld [vmem:[#allocation10 + $0x20] sm:$0xff]   ;;  %v1502_v25 = vld [vmem:[#allocation10 + $0x10] sm:$0xff]  }
  0x8b   :  { %1325 = vmatprep.subr.bf16.mxu0 %v1857_v0  ;;  %1345 = vmatprep.subr.bf16.mxu1 %v1857_v0  ;;  %v1501_v24 = vld [vmem:[#allocation10 + $0x18] sm:$0xff]   ;;  %v1503_v26 = vld [vmem:[#allocation10 + $0x8] sm:$0xff]   ;;  %v1504_v27 = vld [vmem:[#allocation10] sm:$0xff]  }
  0x8c   :  { %v1505_v28 = vld [vmem:[#allocation11 + $0x70] ss:$8 sps:$4 sm:$0xff]   ;;  %v1507_v29 = vld [vmem:[#allocation11 + $0x74] ss:$8 sps:$4 sm:$0xff]   ;;  %v1510_v30 = vld [vmem:[#allocation11 + $0x64] ss:$8 sps:$4 sm:$0xff]  }
  0x8d   :  { %v1508_v31 = vld [vmem:[#allocation11 + $0x60] ss:$8 sps:$4 sm:$0xff]   ;;  %v1513_v32 = vld [vmem:[#allocation11 + $0x54] ss:$8 sps:$4 sm:$0xff]   ;;  %v1511_v33 = vld [vmem:[#allocation11 + $0x50] ss:$8 sps:$4 sm:$0xff]  }
  0x8e   :  { %1326 = vmatpush3.bf16.msra.mxu0 %v1485_v5  ;;  %1346 = vmatpush3.bf16.msra.mxu1 %v1486_v6  ;;  %v1516_v34 = vld [vmem:[#allocation11 + $0x44] ss:$8 sps:$4 sm:$0xff]   ;;  %v1514_v35 = vld [vmem:[#allocation11 + $0x40] ss:$8 sps:$4 sm:$0xff]   ;;  %v1519_v36 = vld [vmem:[#allocation11 + $0x34] ss:$8 sps:$4 sm:$0xff]  }
  0x8f   :  { %1327 = vmatprep.subr.bf16.mxu0 %v1857_v0  ;;  %1347 = vmatprep.subr.bf16.mxu1 %v1857_v0  ;;  %v1517_v37 = vld [vmem:[#allocation11 + $0x30] ss:$8 sps:$4 sm:$0xff]   ;;  %v1522_v38 = vld [vmem:[#allocation11 + $0x24] ss:$8 sps:$4 sm:$0xff]   ;;  %v1520_v39 = vld [vmem:[#allocation11 + $0x20] ss:$8 sps:$4 sm:$0xff]  }
  0x90   :  { %v1525_v40 = vld [vmem:[#allocation11 + $0x14] ss:$8 sps:$4 sm:$0xff]   ;;  %v1523_v41 = vld [vmem:[#allocation11 + $0x10] ss:$8 sps:$4 sm:$0xff]   ;;  %v1528_v55 = vld [vmem:[#allocation11 + $0x4] ss:$8 sps:$4 sm:$0xff]  }
  0x91   :  { %v1197_v44 = vld [vmem:[%s2123_s5] ss:$0 sm:$0xff]  ;;  %v1526_v56 = vld [vmem:[#allocation11] ss:$8 sps:$4 sm:$0xff]   ;;  %v1530_v59 = vld [vmem:[#allocation14 + $0x30] sm:$0xff]  }
  0x92   :  { %1328 = vmatpush3.bf16.msra.mxu0 %v1487_v7  ;;  %1348 = vmatpush3.bf16.msra.mxu1 %v1488_v8  ;;  %v1529_v58 = vld [vmem:[#allocation14 + $0x38] sm:$0xff]   ;;  %v1532_v6 = vld [vmem:[#allocation14 + $0x28] sm:$0xff]   ;;  %v1533_v7 = vld [vmem:[#allocation13 + $0x30] sm:$0xff]  }
  0x93   :  { %1329 = vmatprep.subr.bf16.mxu0 %v1857_v0  ;;  %1349 = vmatprep.subr.bf16.mxu1 %v1857_v0  ;;  %v1198_v60 = vld [vmem:[%s2125_s7] ss:$0 sm:$0xff]  ;;  %v1534_v8 = vld [vmem:[#allocation14 + $0x20] sm:$0xff]  }
  0x94   :  { %v1531_v3 = vld [vmem:[#allocation13 + $0x38] sm:$0xff]   ;;  %v1542_v16 = vld [vmem:[#allocation14] sm:$0xff]  }
  0x96   :  { %1330 = vmatpush3.bf16.msra.mxu0 %v1489_v9  ;;  %1350 = vmatpush3.bf16.msra.mxu1 %v1490_v10  ;;  %v1535_v9 = vld [vmem:[#allocation13 + $0x28] sm:$0xff]   ;;  %v1536_v10 = vld [vmem:[#allocation14 + $0x18] sm:$0xff]  }
  0x97   :  { %1331 = vmatprep.subr.bf16.mxu0 %v1857_v0  ;;  %1351 = vmatprep.subr.bf16.mxu1 %v1857_v0 }
  0x9a   :  { %1332 = vmatpush3.bf16.msra.mxu0 %v1491_v11  ;;  %1352 = vmatpush3.bf16.msra.mxu1 %v1492_v12  ;;  %v1537_v11 = vld [vmem:[#allocation13 + $0x20] sm:$0xff]   ;;  %v1538_v12 = vld [vmem:[#allocation14 + $0x10] sm:$0xff]  }
  0x9b   :  { %1333 = vmatprep.subr.bf16.mxu0 %v1857_v0  ;;  %1353 = vmatprep.subr.bf16.mxu1 %v1857_v0 }
  0x9e   :  { %1334 = vmatpush3.bf16.msra.mxu0 %v1493_v13  ;;  %1354 = vmatpush3.bf16.msra.mxu1 %v1494_v14  ;;  %v1539_v13 = vld [vmem:[#allocation13 + $0x18] sm:$0xff]   ;;  %v1540_v14 = vld [vmem:[#allocation14 + $0x8] sm:$0xff]  }
  0x9f   :  { %1335 = vmatprep.subr.bf16.mxu0 %v1857_v0  ;;  %1355 = vmatprep.subr.bf16.mxu1 %v1857_v0 }
  0xa2   :  { %1336 = vmatpush3.bf16.msra.mxu0 %v1495_v15  ;;  %1356 = vmatpush3.bf16.msra.mxu1 %v1496_v17  ;;  %v1541_v15 = vld [vmem:[#allocation13 + $0x10] sm:$0xff]   ;;  %v1543_v17 = vld [vmem:[#allocation13 + $0x8] sm:$0xff]  }
  0xa3   :  { %1361 = vmatprep.subr.bf16.mxu0 %v1857_v0  ;;  %636 = vmatprep.subr.bf16.mxu1 %v1507_v29 }
  0xa5   :  { %1338 = vmatmul.mubr.bf16.vlgmr.msra.gmra.mxu0 %v2034_v19  ;;  %1358 = vmatmul.mubr.bf16.vlgmr.msra.gmra.mxu1 %v194_v20  ;;  %v1545_v20 = vld [vmem:[#allocation16 + $0x38] sm:$0xff]  }
  0xa6   :  { %1362 = vmatpush3.bf16.msra.mxu0 %v1497_v18  ;;  %1377 = vmatprep.mubr.msk.bf16.mxu0 %vm1858_vm0, %v1857_v0  ;;  %v1544_v18 = vld [vmem:[#allocation13] sm:$0xff]  }
  0xa7   :  { %1363 = vmatprep.subr.bf16.mxu0 %v1857_v0  ;;  %637 = vmatpush1.bf16.msra.mxu1 %v1505_v28  ;;  %v544_v28 = vld [vmem:[%s2127_s9] sm:$0x3] }
  0xa8   :  { %638 = vmatprep.subr.bf16.mxu1 %v1510_v30  ;;  %668 = vmatprep.mubr.bf16.mxu1 %v1859_v57 }
  0xaa   :  { %1364 = vmatpush3.bf16.msra.mxu0 %v1498_v21  ;;  %v1546_v21 = vld [vmem:[#allocation16 + $0x30] sm:$0xff]  }
  0xab   :  { %1365 = vmatprep.subr.bf16.mxu0 %v1857_v0  ;;  %639 = vmatpush1.bf16.msra.mxu1 %v1508_v31 }
  0xac   :  { %640 = vmatprep.subr.bf16.mxu1 %v1513_v32 }
  0xae   :  { %1366 = vmatpush3.bf16.msra.mxu0 %v1499_v22  ;;  %v1547_v22 = vld [vmem:[#allocation16 + $0x28] sm:$0xff]  }
  0xaf   :  { %1367 = vmatprep.subr.bf16.mxu0 %v1857_v0  ;;  %641 = vmatpush1.bf16.msra.mxu1 %v1511_v33 }
  0xb0   :  { %642 = vmatprep.subr.bf16.mxu1 %v1516_v34 }
  0xb2   :  { %1368 = vmatpush3.bf16.msra.mxu0 %v1500_v23  ;;  %v1548_v23 = vld [vmem:[#allocation16 + $0x20] sm:$0xff]  }
  0xb3   :  { %1369 = vmatprep.subr.bf16.mxu0 %v1857_v0  ;;  %643 = vmatpush1.bf16.msra.mxu1 %v1514_v35 }
  0xb4   :  { %644 = vmatprep.subr.bf16.mxu1 %v1519_v36 }
  0xb6   :  { %1370 = vmatpush3.bf16.msra.mxu0 %v1501_v24  ;;  %v1550_v24 = vld [vmem:[#allocation16 + $0x10] sm:$0xff]  }
  0xb7   :  { %1371 = vmatprep.subr.bf16.mxu0 %v1857_v0  ;;  %645 = vmatpush1.bf16.msra.mxu1 %v1517_v37 }
  0xb8   :  { %646 = vmatprep.subr.bf16.mxu1 %v1522_v38 }
  0xba   :  { %1372 = vmatpush3.bf16.msra.mxu0 %v1502_v25  ;;  %v546_v25 = vlaneseq }
  0xbb   :  { %1373 = vmatprep.subr.bf16.mxu0 %v1857_v0  ;;  %647 = vmatpush1.bf16.msra.mxu1 %v1520_v39 }
  0xbc   :  { %648 = vmatprep.subr.bf16.mxu1 %v1525_v40  ;;  %v679_v40 = vld [vmem:[%s2145_s28] sm:$0x3] }
  0xbe   :  { %1374 = vmatpush3.bf16.msra.mxu0 %v1503_v26  ;;  %v547_v26 = vshrl.u32 %v546_v25, 7 }
  0xbf   :  { %1375 = vmatprep.subr.bf16.mxu0 %v1857_v0  ;;  %649 = vmatpush1.bf16.msra.mxu1 %v1523_v41 }
  0xc0   :  { %650 = vmatprep.subr.bf16.mxu1 %v1528_v55  ;;  %v552_v29 = vsub.s32 1, %v547_v26  ;;  %v1557_v55 = vld [vmem:[#allocation17 + $0x18] sm:$0xff]  }
  0xc2   :  { %1376 = vmatpush3.bf16.msra.mxu0 %v1504_v27  ;;  %v548_v27 = vsub.s32 0, %v547_v26  ;;  %v553_v31 = vrot.slane %v544_v28, %v552_v29 }
  0xc3   :  { %1381 = vmatprep.subr.bf16.mxu0 %v1857_v0  ;;  %651 = vmatpush1.bf16.msra.mxu1 %v1526_v56  ;;  %v1558_v56 = vld [vmem:[#allocation17 + $0x10] sm:$0xff]  }
  0xc4   :  { %1401 = vmatprep.subr.bf16.mxu1 %v1857_v0  ;;  %v549_v30 = vrot.slane %v544_v28, %v548_v27 }
 0x165   :  { %v311_v42 = vpop.f32.mrf.mxu0  ;;  %v399_v43 = vpop.f32.mrf.mxu1 }
 0x166   :  { %v400_v45 = vadd.f32 %v399_v43, %v311_v42 }
 0x167   :  { %v1339_v46 = vpop.f32.mrf.mxu0  ;;  %v1359_v47 = vpop.f32.mrf.mxu1 }
 0x168   :  { %v412_v48 = vadd.f32 %v1197_v44, %v400_v45 }
 0x169   :  { %v314_v49 = vpop.f32.mrf.mxu0  ;;  %v402_v50 = vpop.f32.mrf.mxu1 }
 0x16a   :  { %v413_v51 = vmax.f32 %v412_v48, 0.0  ;;  %v1551_v49 = vld [vmem:[#allocation16 + $0x8] sm:$0xff]   ;;  %v1552_v50 = vld [vmem:[#allocation16] sm:$0xff]  }
 0x16b   :  { %v1340_v52 = vpop.f32.mrf.mxu0  ;;  %v1360_v53 = vpop.f32.mrf.mxu1 }
 0x16c   :  { %v414_v54 = vpack.c.bf16 %v413_v51, %v413_v51  ;;  %v1553_v51 = vld [vmem:[#allocation17 + $0x38] sm:$0xff]   ;;  %v1554_v52 = vld [vmem:[#allocation17 + $0x30] sm:$0xff]   ;;  %v1555_v53 = vld [vmem:[#allocation17 + $0x28] sm:$0xff]  }
 0x16e   :  { %1378 = vmatmul.mubr.bf16.vlgmr.msra.gmra.mxu0 %v414_v54  ;;  %v1556_v54 = vld [vmem:[#allocation17 + $0x20] sm:$0xff]  }
 0x16f   :  { %1397 = vmatprep.mubr.msk.bf16.mxu0 %vm1858_vm0, %v1857_v0  ;;  %1382 = vmatpush3.bf16.msra.mxu0 %v1529_v58  ;;  %v1239_v58 = vld [vmem:[%s2130_s12] ss:$0 sm:$0xff]  ;;  %s1860_s12 = smov [#allocation20]  }
 0x170   :  { %1383 = vmatprep.subr.bf16.mxu0 %v1857_v0  ;;  %s1150_s0 = sshll.u32 %s1860_s12, 4  ;;  %s1151_s0 = int_to_ptr.vmem [resolvable:$true] %s1150_s0 }
 0x171   :  { %s1767_s30 = scalar_lea.vmem %s1151_s0, 32  ;;  %p1772_p9 = scmp.lt.s32.totalorder %s1151_s0, %s1151_s0 }
 0x172   :  { %p1768_p8 = scmp.ne.s32.totalorder %s1151_s0, %s1767_s30  ;;  %p1773_p10 = scmp.lt.s32.totalorder %s1767_s30, %s1767_s30 }
 0x173   :  { %1384 = vmatpush3.bf16.msra.mxu0 %v1530_v59 }
 0x174   :  { %1385 = vmatprep.subr.bf16.mxu0 %v1857_v0  ;;  %p1774_p11 = por %p1773_p10, %p1772_p9 }
 0x176   :  { %p1775_p12 = pnand %p1774_p11, %p1768_p8 }
 0x177   :  { %1386 = vmatpush3.bf16.msra.mxu0 %v1532_v6 }
 0x178   :  { %1387 = vmatprep.subr.bf16.mxu0 %v1857_v0 }
 0x17b   :  { %1388 = vmatpush3.bf16.msra.mxu0 %v1534_v8 }
 0x17c   :  { %1389 = vmatprep.subr.bf16.mxu0 %v1857_v0 }
 0x17f   :  { %1390 = vmatpush3.bf16.msra.mxu0 %v1536_v10 }
 0x180   :  { %1391 = vmatprep.subr.bf16.mxu0 %v1857_v0 }
 0x183   :  { %1392 = vmatpush3.bf16.msra.mxu0 %v1538_v12 }
 0x184   :  { %1393 = vmatprep.subr.bf16.mxu0 %v1857_v0 }
 0x187   :  { %1394 = vmatpush3.bf16.msra.mxu0 %v1540_v14 }
 0x188   :  { %1395 = vmatprep.subr.bf16.mxu0 %v1857_v0 }
 0x18b   :  { %1396 = vmatpush3.bf16.msra.mxu0 %v1542_v16 }
 0x18c   :  { %1421 = vmatprep.subr.bf16.mxu0 %v1857_v0 }
 0x18e   :  { %1398 = vmatmul.mubr.bf16.vlgmr.msra.gmra.mxu0 %v2034_v19  ;;  %v1549_v19 = vld [vmem:[#allocation16 + $0x18] sm:$0xff]  }
 0x18f   :  { %1437 = vmatprep.mubr.msk.bf16.mxu0 %vm1858_vm0, %v1857_v0  ;;  %1422 = vmatpush3.bf16.msra.mxu0 %v1545_v20 }
 0x190   :  { %1423 = vmatprep.subr.bf16.mxu0 %v1857_v0 }
 0x193   :  { %1424 = vmatpush3.bf16.msra.mxu0 %v1546_v21 }
 0x194   :  { %1425 = vmatprep.subr.bf16.mxu0 %v1857_v0 }
 0x197   :  { %1426 = vmatpush3.bf16.msra.mxu0 %v1547_v22 }
 0x198   :  { %1427 = vmatprep.subr.bf16.mxu0 %v1857_v0 }
 0x19b   :  { %1428 = vmatpush3.bf16.msra.mxu0 %v1548_v23 }
 0x19c   :  { %1429 = vmatprep.subr.bf16.mxu0 %v1857_v0 }
 0x19f   :  { %1430 = vmatpush3.bf16.msra.mxu0 %v1549_v19 }
 0x1a0   :  { %1431 = vmatprep.subr.bf16.mxu0 %v1857_v0 }
 0x1a3   :  { %1432 = vmatpush3.bf16.msra.mxu0 %v1550_v24 }
 0x1a4   :  { %1433 = vmatprep.subr.bf16.mxu0 %v1857_v0 }
 0x1a7   :  { %1434 = vmatpush3.bf16.msra.mxu0 %v1551_v49 }
 0x1a8   :  { %1435 = vmatprep.subr.bf16.mxu0 %v1857_v0 }
 0x1ab   :  { %1436 = vmatpush3.bf16.msra.mxu0 %v1552_v50 }
 0x22e   :  { %v520_v61 = vpop.f32.mrf.mxu0 }
 0x22f   :  { %v521_v62 = vadd.f32 %v1198_v60, %v520_v61 }
 0x230   :  { %v1379_v63 = vpop.f32.mrf.mxu0 }
 0x231   :  { %v526_v1 = vmax.f32 %v521_v62, 0.0 }
 0x232   :  { %v523_v2 = vpop.f32.mrf.mxu0 }
 0x233   :  { %v527_v4 = vpack.c.bf16 %v526_v1, %v526_v1 }
 0x234   :  { %v1380_v5 = vpop.f32.mrf.mxu0 }
 0x235   :  { %669 = vmatmul.mubr.bf16.vlgmr.msra.gmra.mxu1 %v527_v4  ;;  %v1560_v4 = vld [vmem:[#allocation17] sm:$0xff]   ;;  %v1240_v5 = vld [vmem:[%s2132_s14] ss:$0 sm:$0xff] }
 0x236   :  { %1402 = vmatpush3.bf16.msra.mxu1 %v1531_v3  ;;  %1417 = vmatprep.mubr.msk.bf16.mxu1 %vm1858_vm0, %v1857_v0  ;;  %v1559_v3 = vld [vmem:[#allocation17 + $0x8] sm:$0xff]  }
 0x237   :  { %1403 = vmatprep.subr.bf16.mxu1 %v1857_v0 }
 0x23a   :  { %1404 = vmatpush3.bf16.msra.mxu1 %v1533_v7 }
 0x23b   :  { %1405 = vmatprep.subr.bf16.mxu1 %v1857_v0 }
 0x23e   :  { %1406 = vmatpush3.bf16.msra.mxu1 %v1535_v9 }
 0x23f   :  { %1407 = vmatprep.subr.bf16.mxu1 %v1857_v0 }
 0x242   :  { %1408 = vmatpush3.bf16.msra.mxu1 %v1537_v11 }
 0x243   :  { %1409 = vmatprep.subr.bf16.mxu1 %v1857_v0 }
 0x246   :  { %1410 = vmatpush3.bf16.msra.mxu1 %v1539_v13 }
 0x247   :  { %1411 = vmatprep.subr.bf16.mxu1 %v1857_v0 }
 0x24a   :  { %1412 = vmatpush3.bf16.msra.mxu1 %v1541_v15 }
 0x24b   :  { %1413 = vmatprep.subr.bf16.mxu1 %v1857_v0 }
 0x24e   :  { %1414 = vmatpush3.bf16.msra.mxu1 %v1543_v17  ;;  %v800_v45 = vpop.f32.mrf.mxu0 }
 0x24f   :  { %1415 = vmatprep.subr.bf16.mxu1 %v1857_v0 }
 0x250   :  { %v1399_v46 = vpop.f32.mrf.mxu0 }
 0x252   :  { %1416 = vmatpush3.bf16.msra.mxu1 %v1544_v18  ;;  %v803_v47 = vpop.f32.mrf.mxu0 }
 0x253   :  { %1441 = vmatprep.subr.bf16.mxu1 %v1857_v0 }
 0x254   :  { %v1400_v48 = vpop.f32.mrf.mxu0 }
 0x2f5   :  { %v670_v32 = vpop.f32.mrf.mxu1 }
 0x2f6   :  { %v671_v33 = vadd.f32 %v670_v32, %v549_v30 }
 0x2f7   :  { %v672_v34 = vpop.f32.mrf.mxu1 }
 0x2f8   :  { %677 = vst [vmem:[#allocation20] sm:$0x3] %v671_v33  ;;  %v673_v35 = vadd.f32 %v672_v34, %v553_v31 }
 0x2f9   :  { %v674_v36 = vpop.f32.mrf.mxu1 }
 0x2fa   :  { %678 = vst [vmem:[#allocation22] sm:$0x3] %v673_v35  ;;  %v680_v37 = vmul.f32 0.5, %v673_v35 }
 0x2fb   :  { %v675_v38 = vpop.f32.mrf.mxu1 }
 0x2fc   :  { %v681_v39 = vmul.f32 1.442695, %v680_v37 }
 0x2fe   :  { %1561 = vpow2.f32 %v681_v39 }
 0x30b   :  { %v1562_v41 = vpop.eup %1561 }
 0x30c   :  { %v683_v42 = vmul.f32 %v1562_v41, %v679_v40 }
 0x30e   :  { %v684_v43 = vadd.f32 %v683_v42, %v671_v33 }
 0x310   :  { %v685_v44 = vpack.c.bf16 %v684_v43, %v684_v43 }
 0x312   :  { %1418 = vmatmul.mubr.bf16.vlgmr.msra.gmra.mxu1 %v685_v44 }
 0x313   :  { %1457 = vmatprep.mubr.msk.bf16.mxu1 %vm1858_vm0, %v1857_v0  ;;  %1442 = vmatpush3.bf16.msra.mxu1 %v1553_v51 }
 0x314   :  { %1443 = vmatprep.subr.bf16.mxu1 %v1857_v0 }
 0x317   :  { %1444 = vmatpush3.bf16.msra.mxu1 %v1554_v52 }
 0x318   :  { %1445 = vmatprep.subr.bf16.mxu1 %v1857_v0 }
 0x31b   :  { %1446 = vmatpush3.bf16.msra.mxu1 %v1555_v53 }
 0x31c   :  { %1447 = vmatprep.subr.bf16.mxu1 %v1857_v0 }
 0x31f   :  { %1448 = vmatpush3.bf16.msra.mxu1 %v1556_v54 }
 0x320   :  { %1449 = vmatprep.subr.bf16.mxu1 %v1857_v0 }
 0x323   :  { %1450 = vmatpush3.bf16.msra.mxu1 %v1557_v55 }
 0x324   :  { %1451 = vmatprep.subr.bf16.mxu1 %v1857_v0 }
 0x327   :  { %1452 = vmatpush3.bf16.msra.mxu1 %v1558_v56 }
 0x328   :  { %1453 = vmatprep.subr.bf16.mxu1 %v1857_v0 }
 0x32b   :  { %1454 = vmatpush3.bf16.msra.mxu1 %v1559_v3 }
 0x32c   :  { %1455 = vmatprep.subr.bf16.mxu1 %v1857_v0 }
 0x32f   :  { %1456 = vmatpush3.bf16.msra.mxu1 %v1560_v4 }
 0x3d2   :  { %v888_v57 = vpop.f32.mrf.mxu1 }
 0x3d3   :  { %v889_v59 = vadd.f32 %v888_v57, %v800_v45 }
 0x3d4   :  { %v1419_v60 = vpop.f32.mrf.mxu1 }
 0x3d5   :  { %v901_v61 = vadd.f32 %v1239_v58, %v889_v59 }
 0x3d6   :  { %v891_v62 = vpop.f32.mrf.mxu1 }
 0x3d7   :  { %v902_v63 = vmax.f32 %v901_v61, 0.0 }
 0x3d8   :  { %v1420_v1 = vpop.f32.mrf.mxu1 }
 0x3d9   :  { %v903_v2 = vpack.c.bf16 %v902_v63, %v902_v63 }
 0x3db   :  { %1438 = vmatmul.mubr.bf16.vlgmr.msra.gmra.mxu0 %v903_v2 }
 0x49b   :  { %v1009_v6 = vpop.f32.mrf.mxu0 }
 0x49c   :  { %v1010_v7 = vadd.f32 %v1240_v5, %v1009_v6 }
 0x49d   :  { %v1439_v8 = vpop.f32.mrf.mxu0 }
 0x49e   :  { %v1015_v9 = vmax.f32 %v1010_v7, 0.0 }
 0x49f   :  { %v1012_v10 = vpop.f32.mrf.mxu0 }
 0x4a0   :  { %v1016_v11 = vpack.c.bf16 %v1015_v9, %v1015_v9 }
 0x4a1   :  { %v1440_v12 = vpop.f32.mrf.mxu0 }
 0x4a2   :  { %1458 = vmatmul.mubr.bf16.vlgmr.msra.gmra.mxu1 %v1016_v11 }
 0x4a3   :  { %1778 = shalt.err (!%p1775_p12)
}
 0x4a4   :  { %1153 = dma.vmem_to_hbm [thread:$0]  %s1151_s0, 32, %s2136_s18, [#allocation21]  }
 0x4a5   :  { %s1861_s21 = smov [#allocation22]  }
 0x4a6   :  { %s1160_s6 = sshll.u32 %s1861_s21, 4  ;;  %s1161_s6 = int_to_ptr.vmem [resolvable:$true] %s1160_s6 }
 0x4a7   :  { %s1787_s1 = scalar_lea.vmem %s1161_s6, 32  ;;  %p1792_p0 = scmp.lt.s32.totalorder %s1161_s6, %s1161_s6 }
 0x4a8   :  { %p1788_p13 = scmp.ne.s32.totalorder %s1161_s6, %s1787_s1  ;;  %p1793_p1 = scmp.lt.s32.totalorder %s1787_s1, %s1787_s1 }
 0x4aa   :  { %p1794_p2 = por %p1793_p1, %p1792_p0 }
 0x4ac   :  { %p1795_p3 = pnand %p1794_p2, %p1788_p13 }
 0x4ae   :  { %1798 = shalt.err (!%p1795_p3)
}
 0x4af   :  { %1163 = dma.vmem_to_hbm [thread:$0]  %s1161_s6, 32, %s2137_s19, [#allocation21]   ;;  %v1249_v0 = vld [vmem:[%s2134_s16] ss:$0 sm:$0xff] }
 0x4b0   :  { %s1862_s18 = smov [#allocation19]  }
 0x4b1   :  { %s1140_s10 = sshll.u32 %s1862_s18, 4  ;;  %s1141_s10 = int_to_ptr.vmem [resolvable:$true] %s1140_s10 }
 0x4b2   :  { %s1807_s19 = scalar_lea.vmem %s1141_s10, 32  ;;  %p1812_p5 = scmp.lt.s32.totalorder %s1141_s10, %s1141_s10 }
 0x4b3   :  { %p1808_p4 = scmp.ne.s32.totalorder %s1141_s10, %s1807_s19  ;;  %p1813_p6 = scmp.lt.s32.totalorder %s1807_s19, %s1807_s19 }
 0x4b5   :  { %p1814_p7 = por %p1813_p6, %p1812_p5 }
 0x4b7   :  { %p1815_p8 = pnand %p1814_p7, %p1808_p4 }
 0x562   :  { %v1122_v13 = vpop.f32.mrf.mxu1 }
 0x563   :  { %v1123_v14 = vadd.f32 %v1249_v0, %v1122_v13 }
 0x564   :  { %v1459_v15 = vpop.f32.mrf.mxu1 }
 0x565   :  { %v1128_v16 = vsub.f32 0.0, %v1123_v14 }
 0x566   :  { %v1125_v17 = vpop.f32.mrf.mxu1 }
 0x567   :  { %v1129_v18 = vmul.f32 1.442695, %v1128_v16 }
 0x568   :  { %v1460_v20 = vpop.f32.mrf.mxu1 }
 0x569   :  { %1563 = vpow2.f32 %v1129_v18 }
 0x576   :  { %v1564_v21 = vpop.eup %1563 }
 0x577   :  { %v1131_v22 = vadd.f32 1.0, %v1564_v21 }
 0x579   :  { %1565 = vrcp.f32 %v1131_v22 }
 0x586   :  { %v1566_v23 = vpop.eup %1565 }
 0x587   :  { %1133 = vst [vmem:[#allocation19] sm:$0x3] %v1566_v23 }
 0x588   :  { %1818 = shalt.err (!%p1815_p8)
}
 0x589   :  { %1143 = dma.vmem_to_hbm [thread:$0]  %s1141_s10, 32, %s2135_s17, [#allocation4]  }
 0x58a   :  { %1839 = dma.done.wait [#allocation4], 32  }
 0x58b   :  { %1840 = vsyncadd [#allocation4], 4294967264 }
 0x58c   :  { %1841 = dma.done.wait [#allocation21], 64  }
 0x58d   :  { %1842 = vsyncadd [#allocation21], 4294967232 }
 0x58e   :  { %1173 = vsyncpa [#allocation3], 1 }
 0x58f   :  { %1174 = vsyncpa [#allocation6], 1 }
 0x590   :  { %1175 = vsyncpa [#allocation9], 1 }
 0x591   :  { %1176 = vsyncpa [#allocation12], 1 }
 0x592   :  { %1177 = vsyncpa [#allocation15], 1 }
 0x593   :  { %1178 = vsyncpa [#allocation18], 1 }
 0x594   :  { %1179 = vsyncpa [#allocation4], 1 }
 0x595   :  { %1180 = vsyncpa [#allocation21], 1 }

</bundles_post_ra>
